<compile_context>
chip_gen: v6e
topology: v6e:2x2x1
jax: 0.10.0
libtpu: 0.0.40
codegen_flags: <defaults>
</compile_context>

<pallas_src>
import jax
import jax.numpy as jnp
from jax import lax
from jax.experimental import pallas as pl
from jax.experimental.pallas import tpu as pltpu


LN_EPS = 1e-12  # BERT default (below f32 resolution vs typical variances; kept for parity)


# ----------------------------- shared math -----------------------------

def _layer_norm(x, gamma, beta, eps=LN_EPS):
    mean = jnp.mean(x, axis=-1, keepdims=True)
    var = jnp.mean((x - mean) ** 2, axis=-1, keepdims=True)
    return (x - mean) * lax.rsqrt(var + eps) * gamma + beta


def _encode_tower(ids, mask3, tok, pos, ln, wqkv, bqkv, wo, bo, w1, b1, w2, b2):
    """One 1-layer BERT-style tower. Returns the CLS rows (B, H) in f32.

    ids   : (B*S, 1) int32          mask3 : (B, 1, S) f32 (1 = keep, 0 = pad)
    tok   : (V, H) bf16             pos   : (S, H) f32
    ln    : (6, 1, H) f32 = [emb_g, emb_b, ln1_g, ln1_b, ln2_g, ln2_b]
    wqkv  : (H, 3H) bf16, wo: (H, H) bf16, w1: (H, F) bf16, w2: (F, H) bf16; biases f32.
    """
    S, H = pos.shape
    V = tok.shape[0]
    BS = ids.shape[0]
    B = BS // S

    # ---- embedding gather as a bf16 one-hot matmul on the MXU (0/1 exact in bf16) ----
    onehot = jnp.where(
        ids == lax.broadcasted_iota(jnp.int32, (BS, V), 1), 1.0, 0.0
    ).astype(jnp.bfloat16)                                                 # (BS, V)
    x = jnp.dot(onehot, tok, preferred_element_type=jnp.float32)           # (BS, H) f32
    x = _layer_norm(x.reshape(B, S, H) + pos, ln[0], ln[1]).reshape(BS, H)

    # ---- fused QKV: one lane-dense (H, 3H) matmul; single bf16 cast before slicing ----
    qkv = jnp.dot(x.astype(jnp.bfloat16), wqkv,
                  preferred_element_type=jnp.float32) + bqkv               # (BS, 3H) f32
    qkvb = qkv.astype(jnp.bfloat16)
    q = qkvb[:, :H].reshape(B, S, H)
    k = qkvb[:, H:2 * H].reshape(B, S, H)
    v = qkvb[:, 2 * H:].reshape(B, S, H)

    # ---- scaled dot-product attention (einsum: no explicit transpose) ----
    scale = 1.0 / float(H) ** 0.5
    att = jnp.einsum('bqd,bkd->bqk', q, k,
                     preferred_element_type=jnp.float32) * scale           # (B,S,S) f32
    att = att + (1.0 - mask3) * (-1e9)
    att = att - jnp.max(att, axis=-1, keepdims=True)
    p = jnp.exp(att)
    p = p / jnp.sum(p, axis=-1, keepdims=True)      # exact denom: parity with reference
    ctxv = jnp.einsum('bqk,bkd->bqd', p.astype(jnp.bfloat16), v,
                      preferred_element_type=jnp.float32)                  # (B,S,H) f32
    attn_out = jnp.dot(ctxv.reshape(BS, H).astype(jnp.bfloat16), wo,
                       preferred_element_type=jnp.float32) + bo

    h1 = _layer_norm(x + attn_out, ln[2], ln[3])                           # (BS, H) f32

    # ---- GELU FFN ----
    ff = jax.nn.gelu(jnp.dot(h1.astype(jnp.bfloat16), w1,
                             preferred_element_type=jnp.float32) + b1)
    ff = jnp.dot(ff.astype(jnp.bfloat16), w2,
                 preferred_element_type=jnp.float32) + b2
    h2 = _layer_norm(h1 + ff, ln[4], ln[5])

    return h2.reshape(B, S, H)[:, 0, :]                                    # (B, H) CLS


# ------------------- fully fused Reranker forward kernel -------------------

def reranker_kernel(ctx_ids_ref, ctx_mask_ref, cand_ids_ref, cand_mask_ref,
                    tok_ref, pos_ref, ln_ref, wqkv_ref, bqkv_ref,
                    wo_ref, bo_ref, w1_ref, b1_ref, w2_ref, b2_ref,
                    scores_ref, loss_ref):
    # Parameter refs carry a stacked leading axis: [0] = context tower, [1] = candidate.
    def tower_params(e):
        return (tok_ref[e], pos_ref[e], ln_ref[e], wqkv_ref[e], bqkv_ref[e],
                wo_ref[e], bo_ref[e], w1_ref[e], b1_ref[e], w2_ref[e], b2_ref[e])

    ctx_emb = _encode_tower(ctx_ids_ref[...], ctx_mask_ref[...], *tower_params(0))
    cand_emb = _encode_tower(cand_ids_ref[...], cand_mask_ref[...], *tower_params(1))

    # ---- scores = ctx_emb @ cand_emb.T (contract last dims; no transpose) ----
    scores = lax.dot_general(ctx_emb, cand_emb,
                             dimension_numbers=(((1,), (1,)), ((), ())),
                             preferred_element_type=jnp.float32)           # (C, N) f32
    scores_ref[...] = scores

    # ---- in-batch-negatives cross entropy: labels = arange(0, N, N // C) ----
    C, N = scores.shape
    cand_group = N // C
    col = lax.broadcasted_iota(jnp.int32, (C, N), 1)
    row = lax.broadcasted_iota(jnp.int32, (C, N), 0)
    target = col == row * cand_group
    m = jnp.max(scores, axis=-1, keepdims=True)
    lse = m + jnp.log(jnp.sum(jnp.exp(scores - m), axis=-1, keepdims=True))   # (C,1)
    tgt = jnp.sum(jnp.where(target, scores, 0.0), axis=-1, keepdims=True)     # (C,1)
    loss_ref[...] = jnp.sum(lse - tgt, axis=0, keepdims=True) * (1.0 / C)     # (1,1)
    # NOTE: loss kept as a (1,1) VMEM tile (padded store is a one-off per forward);
    # routing it to SMEM is possible but buys nothing at this call count.


@jax.jit
def _fused_forward(ctx_params, cand_params, ctx_ids, ctx_mask, cand_ids, cand_mask):
    C, S = ctx_ids.shape
    N = cand_ids.shape[0]
    stacked = jax.tree_util.tree_map(lambda a, b: jnp.stack([a, b], axis=0),
                                     ctx_params, cand_params)
    vmem = pl.BlockSpec(memory_space=pltpu.MemorySpace.VMEM)
    # Single launch, no grid: every array is a whole-block VMEM resident (all well
    # under the scoped-VMEM limit at these shapes on v5e/v6e/v7x).
    scores, loss = pl.pallas_call(
        reranker_kernel,
        in_specs=[vmem] * 15,
        out_specs=(vmem, vmem),
        out_shape=(jax.ShapeDtypeStruct((C, N), jnp.float32),
                   jax.ShapeDtypeStruct((1, 1), jnp.float32)),
    )(ctx_ids.reshape(C * S, 1).astype(jnp.int32),
      ctx_mask.reshape(C, 1, S).astype(jnp.float32),
      cand_ids.reshape(N * S, 1).astype(jnp.int32),
      cand_mask.reshape(N, 1, S).astype(jnp.float32),
      stacked["tok_emb"], stacked["pos_emb"], stacked["ln"],
      stacked["w_qkv"], stacked["b_qkv"], stacked["w_o"], stacked["b_o"],
      stacked["w1"], stacked["b1"], stacked["w2"], stacked["b2"])
    return scores, loss[0, 0]


def reranker_forward(ctx_params, cand_params, batch, return_type="loss"):
    assert return_type in ("loss", "scores")
    assert batch["candidate_ids"].shape[0] % batch["context_ids"].shape[0] == 0, \
        "candidate batch size must be a multiple of the context batch size"
    scores, loss = _fused_forward(
        ctx_params, cand_params,
        batch["context_ids"], batch["context_attention_mask"],
        batch["candidate_ids"], batch["candidate_attention_mask"])
    return loss if return_type == "loss" else scores


# ----------------------------- parameter init -----------------------------

def init_tower_params(key, vocab, seq, hidden, ffn):
    ks = jax.random.split(key, 6)
    s = 0.02
    g = jnp.ones((1, hidden), jnp.float32)
    b = jnp.zeros((1, hidden), jnp.float32)
    vocab_p = ((vocab + 127) // 128) * 128      # lane-dense one-hot / gather contraction
    tok = jax.random.normal(ks[0], (vocab, hidden), jnp.float32) * s
    tok = jnp.pad(tok, ((0, vocab_p - vocab), (0, 0)))
    return dict(
        tok_emb=tok.astype(jnp.bfloat16),       # bf16 -> single MXU pass for the gather
        pos_emb=jax.random.normal(ks[1], (seq, hidden), jnp.float32) * s,
        # [emb_gamma, emb_beta, ln1_gamma, ln1_beta, ln2_gamma, ln2_beta]
        ln=jnp.stack([g, b, g, b, g, b], axis=0),                          # (6, 1, H)
        w_qkv=(jax.random.normal(ks[2], (hidden, 3 * hidden), jnp.float32) * s
               ).astype(jnp.bfloat16),
        b_qkv=jnp.zeros((1, 3 * hidden), jnp.float32),
        w_o=(jax.random.normal(ks[3], (hidden, hidden), jnp.float32) * s
             ).astype(jnp.bfloat16),
        b_o=jnp.zeros((1, hidden), jnp.float32),
        w1=(jax.random.normal(ks[4], (hidden, ffn), jnp.float32) * s
            ).astype(jnp.bfloat16),
        b1=jnp.zeros((1, ffn), jnp.float32),
        w2=(jax.random.normal(ks[5], (ffn, hidden), jnp.float32) * s
            ).astype(jnp.bfloat16),
        b2=jnp.zeros((1, hidden), jnp.float32),
    )


# ------------------- pure-JAX reference encoder (for checking) -------------------

def encode_ref(ids, mask, p):
    B, S = ids.shape
    H = p["pos_emb"].shape[1]
    x = p["tok_emb"][ids].astype(jnp.float32)                               # == bf16 one-hot matmul
    x = _layer_norm(x + p["pos_emb"], p["ln"][0], p["ln"][1]).reshape(B * S, H)
    qkv = jnp.dot(x.astype(jnp.bfloat16), p["w_qkv"],
                  preferred_element_type=jnp.float32) + p["b_qkv"]
    qkvb = qkv.astype(jnp.bfloat16)
    q = qkvb[:, :H].reshape(B, S, H)
    k = qkvb[:, H:2 * H].reshape(B, S, H)
    v = qkvb[:, 2 * H:].reshape(B, S, H)
    att = jnp.einsum('bqd,bkd->bqk', q, k,
                     preferred_element_type=jnp.float32) * (1.0 / float(H) ** 0.5)
    att = att + (1.0 - mask.reshape(B, 1, S)) * (-1e9)
    p_att = jax.nn.softmax(att, axis=-1)
    ctxv = jnp.einsum('bqk,bkd->bqd', p_att.astype(jnp.bfloat16), v,
                      preferred_element_type=jnp.float32).reshape(B * S, H)
    attn_out = jnp.dot(ctxv.astype(jnp.bfloat16), p["w_o"],
                       preferred_element_type=jnp.float32) + p["b_o"]
    h1 = _layer_norm(x + attn_out, p["ln"][2], p["ln"][3])
    ff = jax.nn.gelu(jnp.dot(h1.astype(jnp.bfloat16), p["w1"],
                             preferred_element_type=jnp.float32) + p["b1"])
    ff = jnp.dot(ff.astype(jnp.bfloat16), p["w2"],
                 preferred_element_type=jnp.float32) + p["b2"]
    h2 = _layer_norm(h1 + ff, p["ln"][4], p["ln"][5])
    return h2.reshape(B, S, H)[:, 0, :]


# --------------------------------- main ------------------------------------

if __name__ == "__main__":
    VOCAB, SEQ, HIDDEN, FFN = 128, 8, 128, 256     # lane-dense V / H / FFN
    CTX_B, CAND_B = 2, 4

    key = jax.random.PRNGKey(0)
    k_ctx, k_cand, k_ids1, k_ids2 = jax.random.split(key, 4)

    ctx_params = init_tower_params(k_ctx, VOCAB, SEQ, HIDDEN, FFN)
    cand_params = init_tower_params(k_cand, VOCAB, SEQ, HIDDEN, FFN)

    context_ids = jax.random.randint(k_ids1, (CTX_B, SEQ), 0, VOCAB, dtype=jnp.int32)
    candidate_ids = jax.random.randint(k_ids2, (CAND_B, SEQ), 0, VOCAB, dtype=jnp.int32)
    context_mask = jnp.ones((CTX_B, SEQ), jnp.float32).at[:, -1].set(0.0)
    candidate_mask = jnp.ones((CAND_B, SEQ), jnp.float32).at[:, -2:].set(0.0)

    batch = dict(context_ids=context_ids,
                 context_attention_mask=context_mask,
                 candidate_ids=candidate_ids,
                 candidate_attention_mask=candidate_mask)

    loss = reranker_forward(ctx_params, cand_params, batch, return_type="loss")
    scores = reranker_forward(ctx_params, cand_params, batch, return_type="scores")
    jax.block_until_ready((loss, scores))

    # sanity check the fused Pallas kernel against a pure-JAX reference (encoder + loss)
    ctx_emb = encode_ref(context_ids, context_mask, ctx_params)
    cand_emb = encode_ref(candidate_ids, candidate_mask, cand_params)
    ref_scores = ctx_emb @ cand_emb.T
    cand_group = CAND_B // CTX_B
    labels = jnp.arange(0, CAND_B, cand_group)
    ref_loss = -jnp.mean(jax.nn.log_softmax(ref_scores, axis=-1)[jnp.arange(CTX_B), labels])
    assert jnp.allclose(scores, ref_scores, rtol=2e-3, atol=2e-3), "score mismatch vs reference"
    assert jnp.allclose(loss, ref_loss, rtol=2e-3, atol=2e-3), "loss mismatch vs reference"

    print("KERNEL_OK")
</pallas_src>

<mosaic_0001>
module attributes {stable_mosaic.version = 11 : i64} {
  func.func @reranker_kernel(%arg0: memref<16x1xi32, #tpu.memory_space<vmem>>, %arg1: memref<2x1x8xf32, #tpu.memory_space<vmem>>, %arg2: memref<32x1xi32, #tpu.memory_space<vmem>>, %arg3: memref<4x1x8xf32, #tpu.memory_space<vmem>>, %arg4: memref<2x128x128xbf16, #tpu.memory_space<vmem>>, %arg5: memref<2x8x128xf32, #tpu.memory_space<vmem>>, %arg6: memref<2x6x1x128xf32, #tpu.memory_space<vmem>>, %arg7: memref<2x128x384xbf16, #tpu.memory_space<vmem>>, %arg8: memref<2x1x384xf32, #tpu.memory_space<vmem>>, %arg9: memref<2x128x128xbf16, #tpu.memory_space<vmem>>, %arg10: memref<2x1x128xf32, #tpu.memory_space<vmem>>, %arg11: memref<2x128x256xbf16, #tpu.memory_space<vmem>>, %arg12: memref<2x1x256xf32, #tpu.memory_space<vmem>>, %arg13: memref<2x256x128xbf16, #tpu.memory_space<vmem>>, %arg14: memref<2x1x128xf32, #tpu.memory_space<vmem>>, %arg15: memref<2x4xf32, #tpu.memory_space<vmem>>, %arg16: memref<1x1xf32, #tpu.memory_space<vmem>>) attributes {dimension_semantics = [], scalar_prefetch = 0 : i64, scratch_operands = 0 : i64, tpu.core_type = #tpu.core_type<tc>} {
    %c0 = arith.constant 0 : index
    %c0_0 = arith.constant 0 : index
    %0 = vector.load %arg0[%c0, %c0_0] : memref<16x1xi32, #tpu.memory_space<vmem>>, vector<16x1xi32>
    %c0_1 = arith.constant 0 : index
    %c0_2 = arith.constant 0 : index
    %c0_3 = arith.constant 0 : index
    %1 = vector.load %arg1[%c0_1, %c0_2, %c0_3] : memref<2x1x8xf32, #tpu.memory_space<vmem>>, vector<2x1x8xf32>
    %c0_4 = arith.constant 0 : index
    %c0_5 = arith.constant 0 : index
    %c0_6 = arith.constant 0 : index
    %2 = vector.load %arg4[%c0_4, %c0_5, %c0_6] : memref<2x128x128xbf16, #tpu.memory_space<vmem>>, vector<1x128x128xbf16>
    %3 = vector.shape_cast %2 : vector<1x128x128xbf16> to vector<128x128xbf16>
    %c0_7 = arith.constant 0 : index
    %c0_8 = arith.constant 0 : index
    %c0_9 = arith.constant 0 : index
    %4 = vector.load %arg5[%c0_7, %c0_8, %c0_9] : memref<2x8x128xf32, #tpu.memory_space<vmem>>, vector<1x8x128xf32>
    %5 = vector.shape_cast %4 : vector<1x8x128xf32> to vector<8x128xf32>
    %c0_10 = arith.constant 0 : index
    %c0_11 = arith.constant 0 : index
    %c0_12 = arith.constant 0 : index
    %c0_13 = arith.constant 0 : index
    %6 = vector.load %arg6[%c0_10, %c0_11, %c0_12, %c0_13] : memref<2x6x1x128xf32, #tpu.memory_space<vmem>>, vector<1x6x1x128xf32>
    %7 = vector.shape_cast %6 : vector<1x6x1x128xf32> to vector<6x1x128xf32>
    %c0_14 = arith.constant 0 : index
    %c0_15 = arith.constant 0 : index
    %c0_16 = arith.constant 0 : index
    %8 = vector.load %arg7[%c0_14, %c0_15, %c0_16] : memref<2x128x384xbf16, #tpu.memory_space<vmem>>, vector<1x128x384xbf16>
    %9 = vector.shape_cast %8 : vector<1x128x384xbf16> to vector<128x384xbf16>
    %c0_17 = arith.constant 0 : index
    %c0_18 = arith.constant 0 : index
    %c0_19 = arith.constant 0 : index
    %10 = vector.load %arg8[%c0_17, %c0_18, %c0_19] : memref<2x1x384xf32, #tpu.memory_space<vmem>>, vector<1x1x384xf32>
    %11 = vector.shape_cast %10 : vector<1x1x384xf32> to vector<1x384xf32>
    %c0_20 = arith.constant 0 : index
    %c0_21 = arith.constant 0 : index
    %c0_22 = arith.constant 0 : index
    %12 = vector.load %arg9[%c0_20, %c0_21, %c0_22] : memref<2x128x128xbf16, #tpu.memory_space<vmem>>, vector<1x128x128xbf16>
    %13 = vector.shape_cast %12 : vector<1x128x128xbf16> to vector<128x128xbf16>
    %c0_23 = arith.constant 0 : index
    %c0_24 = arith.constant 0 : index
    %c0_25 = arith.constant 0 : index
    %14 = vector.load %arg10[%c0_23, %c0_24, %c0_25] : memref<2x1x128xf32, #tpu.memory_space<vmem>>, vector<1x1x128xf32>
    %15 = vector.shape_cast %14 : vector<1x1x128xf32> to vector<1x128xf32>
    %c0_26 = arith.constant 0 : index
    %c0_27 = arith.constant 0 : index
    %c0_28 = arith.constant 0 : index
    %16 = vector.load %arg11[%c0_26, %c0_27, %c0_28] : memref<2x128x256xbf16, #tpu.memory_space<vmem>>, vector<1x128x256xbf16>
    %17 = vector.shape_cast %16 : vector<1x128x256xbf16> to vector<128x256xbf16>
    %c0_29 = arith.constant 0 : index
    %c0_30 = arith.constant 0 : index
    %c0_31 = arith.constant 0 : index
    %18 = vector.load %arg12[%c0_29, %c0_30, %c0_31] : memref<2x1x256xf32, #tpu.memory_space<vmem>>, vector<1x1x256xf32>
    %19 = vector.shape_cast %18 : vector<1x1x256xf32> to vector<1x256xf32>
    %c0_32 = arith.constant 0 : index
    %c0_33 = arith.constant 0 : index
    %c0_34 = arith.constant 0 : index
    %20 = vector.load %arg13[%c0_32, %c0_33, %c0_34] : memref<2x256x128xbf16, #tpu.memory_space<vmem>>, vector<1x256x128xbf16>
    %21 = vector.shape_cast %20 : vector<1x256x128xbf16> to vector<256x128xbf16>
    %c0_35 = arith.constant 0 : index
    %c0_36 = arith.constant 0 : index
    %c0_37 = arith.constant 0 : index
    %22 = vector.load %arg14[%c0_35, %c0_36, %c0_37] : memref<2x1x128xf32, #tpu.memory_space<vmem>>, vector<1x1x128xf32>
    %23 = vector.shape_cast %22 : vector<1x1x128xf32> to vector<1x128xf32>
    %24 = tpu.iota {dimensions = array<i32: 1>} : vector<16x128xi32>
    %25 = vector.broadcast %0 : vector<16x1xi32> to vector<16x128xi32>
    %26 = arith.cmpi eq, %25, %24 : vector<16x128xi32>
    %cst = arith.constant 1.000000e+00 : f32
    %cst_38 = arith.constant 0.000000e+00 : f32
    %27 = vector.broadcast %cst : f32 to vector<16x128xf32>
    %28 = vector.broadcast %cst_38 : f32 to vector<16x128xf32>
    %29 = arith.select %26, %27, %28 : vector<16x128xi1>, vector<16x128xf32>
    %30 = arith.truncf %29 : vector<16x128xf32> to vector<16x128xbf16>
    %cst_39 = arith.constant dense<0.000000e+00> : vector<16x128xf32>
    %31 = tpu.matmul %30, %3, %cst_39 {dimension_numbers = #tpu.dot_dimension_numbers<[1], [0], [0], [1], [0, 0, 1, 1], [], []>} : vector<16x128xbf16>, vector<128x128xbf16>, vector<16x128xf32> -> vector<16x128xf32>
    %32 = vector.shape_cast %31 : vector<16x128xf32> to vector<2x8x128xf32>
    %33 = vector.shape_cast %5 : vector<8x128xf32> to vector<1x8x128xf32>
    %34 = vector.broadcast %33 : vector<1x8x128xf32> to vector<2x8x128xf32>
    %35 = arith.addf %32, %34 : vector<2x8x128xf32>
    %36 = vector.extract_strided_slice %7 {offsets = [0, 0, 0], sizes = [1, 1, 128], strides = [1, 1, 1]} : vector<6x1x128xf32> to vector<1x1x128xf32>
    %37 = vector.shape_cast %36 : vector<1x1x128xf32> to vector<1x128xf32>
    %38 = vector.extract_strided_slice %7 {offsets = [1, 0, 0], sizes = [1, 1, 128], strides = [1, 1, 1]} : vector<6x1x128xf32> to vector<1x1x128xf32>
    %39 = vector.shape_cast %38 : vector<1x1x128xf32> to vector<1x128xf32>
    %cst_40 = arith.constant dense<0.000000e+00> : vector<2x8xf32>
    %40 = vector.multi_reduction <add>, %35, %cst_40 [2] : vector<2x8x128xf32> to vector<2x8xf32>
    %41 = vector.shape_cast %40 : vector<2x8xf32> to vector<2x8x1xf32>
    %cst_41 = arith.constant 1.280000e+02 : f32
    %42 = vector.broadcast %cst_41 : f32 to vector<2x8x1xf32>
    %43 = arith.divf %41, %42 : vector<2x8x1xf32>
    %44 = vector.broadcast %43 : vector<2x8x1xf32> to vector<2x8x128xf32>
    %45 = arith.subf %35, %44 : vector<2x8x128xf32>
    %46 = arith.mulf %45, %45 : vector<2x8x128xf32>
    %cst_42 = arith.constant dense<0.000000e+00> : vector<2x8xf32>
    %47 = vector.multi_reduction <add>, %46, %cst_42 [2] : vector<2x8x128xf32> to vector<2x8xf32>
    %48 = vector.shape_cast %47 : vector<2x8xf32> to vector<2x8x1xf32>
    %cst_43 = arith.constant 1.280000e+02 : f32
    %49 = vector.broadcast %cst_43 : f32 to vector<2x8x1xf32>
    %50 = arith.divf %48, %49 : vector<2x8x1xf32>
    %51 = vector.broadcast %43 : vector<2x8x1xf32> to vector<2x8x128xf32>
    %52 = arith.subf %35, %51 : vector<2x8x128xf32>
    %cst_44 = arith.constant 9.99999996E-13 : f32
    %53 = vector.broadcast %cst_44 : f32 to vector<2x8x1xf32>
    %54 = arith.addf %50, %53 : vector<2x8x1xf32>
    %55 = math.rsqrt %54 : vector<2x8x1xf32>
    %56 = vector.broadcast %55 : vector<2x8x1xf32> to vector<2x8x128xf32>
    %57 = arith.mulf %52, %56 : vector<2x8x128xf32>
    %58 = vector.shape_cast %37 : vector<1x128xf32> to vector<1x1x128xf32>
    %59 = vector.broadcast %58 : vector<1x1x128xf32> to vector<2x8x128xf32>
    %60 = arith.mulf %57, %59 : vector<2x8x128xf32>
    %61 = vector.shape_cast %39 : vector<1x128xf32> to vector<1x1x128xf32>
    %62 = vector.broadcast %61 : vector<1x1x128xf32> to vector<2x8x128xf32>
    %63 = arith.addf %60, %62 : vector<2x8x128xf32>
    %64 = vector.shape_cast %63 : vector<2x8x128xf32> to vector<16x128xf32>
    %65 = arith.truncf %64 : vector<16x128xf32> to vector<16x128xbf16>
    %cst_45 = arith.constant dense<0.000000e+00> : vector<16x384xf32>
    %66 = tpu.matmul %65, %9, %cst_45 {dimension_numbers = #tpu.dot_dimension_numbers<[1], [0], [0], [1], [0, 0, 1, 1], [], []>} : vector<16x128xbf16>, vector<128x384xbf16>, vector<16x384xf32> -> vector<16x384xf32>
    %67 = vector.broadcast %11 : vector<1x384xf32> to vector<16x384xf32>
    %68 = arith.addf %66, %67 : vector<16x384xf32>
    %69 = arith.truncf %68 : vector<16x384xf32> to vector<16x384xbf16>
    %70 = vector.extract_strided_slice %69 {offsets = [0, 0], sizes = [16, 128], strides = [1, 1]} : vector<16x384xbf16> to vector<16x128xbf16>
    %71 = vector.shape_cast %70 : vector<16x128xbf16> to vector<2x8x128xbf16>
    %72 = vector.extract_strided_slice %69 {offsets = [0, 128], sizes = [16, 128], strides = [1, 1]} : vector<16x384xbf16> to vector<16x128xbf16>
    %73 = vector.shape_cast %72 : vector<16x128xbf16> to vector<2x8x128xbf16>
    %74 = vector.extract_strided_slice %69 {offsets = [0, 256], sizes = [16, 128], strides = [1, 1]} : vector<16x384xbf16> to vector<16x128xbf16>
    %75 = vector.shape_cast %74 : vector<16x128xbf16> to vector<2x8x128xbf16>
    "tpu.trace_start"() <{level = 10 : i32, message = "bqd,bkd->bqk"}> : () -> ()
    %cst_46 = arith.constant dense<0.000000e+00> : vector<2x8x8xf32>
    %76 = tpu.matmul %71, %73, %cst_46 {dimension_numbers = #tpu.dot_dimension_numbers<[2], [2], [1], [1], [0, 0, 0, 1, 1, 1], [0], [0]>} : vector<2x8x128xbf16>, vector<2x8x128xbf16>, vector<2x8x8xf32> -> vector<2x8x8xf32>
    "tpu.trace_stop"() : () -> ()
    %cst_47 = arith.constant 0.0883883461 : f32
    %77 = vector.broadcast %cst_47 : f32 to vector<2x8x8xf32>
    %78 = arith.mulf %76, %77 : vector<2x8x8xf32>
    %cst_48 = arith.constant 1.000000e+00 : f32
    %79 = vector.broadcast %cst_48 : f32 to vector<2x1x8xf32>
    %80 = arith.subf %79, %1 : vector<2x1x8xf32>
    %cst_49 = arith.constant -1.000000e+09 : f32
    %81 = vector.broadcast %cst_49 : f32 to vector<2x1x8xf32>
    %82 = arith.mulf %80, %81 : vector<2x1x8xf32>
    %83 = vector.broadcast %82 : vector<2x1x8xf32> to vector<2x8x8xf32>
    %84 = arith.addf %78, %83 : vector<2x8x8xf32>
    %cst_50 = arith.constant dense<0xFF800000> : vector<2x8xf32>
    %85 = vector.multi_reduction <maximumf>, %84, %cst_50 [2] : vector<2x8x8xf32> to vector<2x8xf32>
    %86 = vector.shape_cast %85 : vector<2x8xf32> to vector<2x8x1xf32>
    %87 = vector.broadcast %86 : vector<2x8x1xf32> to vector<2x8x8xf32>
    %88 = arith.subf %84, %87 : vector<2x8x8xf32>
    %89 = math.exp %88 : vector<2x8x8xf32>
    %cst_51 = arith.constant dense<0.000000e+00> : vector<2x8xf32>
    %90 = vector.multi_reduction <add>, %89, %cst_51 [2] : vector<2x8x8xf32> to vector<2x8xf32>
    %91 = vector.shape_cast %90 : vector<2x8xf32> to vector<2x8x1xf32>
    %92 = vector.broadcast %91 : vector<2x8x1xf32> to vector<2x8x8xf32>
    %93 = arith.divf %89, %92 : vector<2x8x8xf32>
    %94 = arith.truncf %93 : vector<2x8x8xf32> to vector<2x8x8xbf16>
    "tpu.trace_start"() <{level = 10 : i32, message = "bqk,bkd->bqd"}> : () -> ()
    %cst_52 = arith.constant dense<0.000000e+00> : vector<2x8x128xf32>
    %95 = tpu.matmul %94, %75, %cst_52 {dimension_numbers = #tpu.dot_dimension_numbers<[2], [1], [1], [2], [0, 0, 0, 1, 1, 2], [0], [0]>} : vector<2x8x8xbf16>, vector<2x8x128xbf16>, vector<2x8x128xf32> -> vector<2x8x128xf32>
    "tpu.trace_stop"() : () -> ()
    %96 = vector.shape_cast %95 : vector<2x8x128xf32> to vector<16x128xf32>
    %97 = arith.truncf %96 : vector<16x128xf32> to vector<16x128xbf16>
    %cst_53 = arith.constant dense<0.000000e+00> : vector<16x128xf32>
    %98 = tpu.matmul %97, %13, %cst_53 {dimension_numbers = #tpu.dot_dimension_numbers<[1], [0], [0], [1], [0, 0, 1, 1], [], []>} : vector<16x128xbf16>, vector<128x128xbf16>, vector<16x128xf32> -> vector<16x128xf32>
    %99 = vector.broadcast %15 : vector<1x128xf32> to vector<16x128xf32>
    %100 = arith.addf %98, %99 : vector<16x128xf32>
    %101 = arith.addf %64, %100 : vector<16x128xf32>
    %102 = vector.extract_strided_slice %7 {offsets = [2, 0, 0], sizes = [1, 1, 128], strides = [1, 1, 1]} : vector<6x1x128xf32> to vector<1x1x128xf32>
    %103 = vector.shape_cast %102 : vector<1x1x128xf32> to vector<1x128xf32>
    %104 = vector.extract_strided_slice %7 {offsets = [3, 0, 0], sizes = [1, 1, 128], strides = [1, 1, 1]} : vector<6x1x128xf32> to vector<1x1x128xf32>
    %105 = vector.shape_cast %104 : vector<1x1x128xf32> to vector<1x128xf32>
    %cst_54 = arith.constant dense<0.000000e+00> : vector<16xf32>
    %106 = vector.multi_reduction <add>, %101, %cst_54 [1] : vector<16x128xf32> to vector<16xf32>
    %107 = vector.shape_cast %106 : vector<16xf32> to vector<16x1xf32>
    %cst_55 = arith.constant 1.280000e+02 : f32
    %108 = vector.broadcast %cst_55 : f32 to vector<16x1xf32>
    %109 = arith.divf %107, %108 : vector<16x1xf32>
    %110 = vector.broadcast %109 : vector<16x1xf32> to vector<16x128xf32>
    %111 = arith.subf %101, %110 : vector<16x128xf32>
    %112 = arith.mulf %111, %111 : vector<16x128xf32>
    %cst_56 = arith.constant dense<0.000000e+00> : vector<16xf32>
    %113 = vector.multi_reduction <add>, %112, %cst_56 [1] : vector<16x128xf32> to vector<16xf32>
    %114 = vector.shape_cast %113 : vector<16xf32> to vector<16x1xf32>
    %cst_57 = arith.constant 1.280000e+02 : f32
    %115 = vector.broadcast %cst_57 : f32 to vector<16x1xf32>
    %116 = arith.divf %114, %115 : vector<16x1xf32>
    %117 = vector.broadcast %109 : vector<16x1xf32> to vector<16x128xf32>
    %118 = arith.subf %101, %117 : vector<16x128xf32>
    %cst_58 = arith.constant 9.99999996E-13 : f32
    %119 = vector.broadcast %cst_58 : f32 to vector<16x1xf32>
    %120 = arith.addf %116, %119 : vector<16x1xf32>
    %121 = math.rsqrt %120 : vector<16x1xf32>
    %122 = vector.broadcast %121 : vector<16x1xf32> to vector<16x128xf32>
    %123 = arith.mulf %118, %122 : vector<16x128xf32>
    %124 = vector.broadcast %103 : vector<1x128xf32> to vector<16x128xf32>
    %125 = arith.mulf %123, %124 : vector<16x128xf32>
    %126 = vector.broadcast %105 : vector<1x128xf32> to vector<16x128xf32>
    %127 = arith.addf %125, %126 : vector<16x128xf32>
    %128 = arith.truncf %127 : vector<16x128xf32> to vector<16x128xbf16>
    %cst_59 = arith.constant dense<0.000000e+00> : vector<16x256xf32>
    %129 = tpu.matmul %128, %17, %cst_59 {dimension_numbers = #tpu.dot_dimension_numbers<[1], [0], [0], [1], [0, 0, 1, 1], [], []>} : vector<16x128xbf16>, vector<128x256xbf16>, vector<16x256xf32> -> vector<16x256xf32>
    %130 = vector.broadcast %19 : vector<1x256xf32> to vector<16x256xf32>
    %131 = arith.addf %129, %130 : vector<16x256xf32>
    %132 = arith.mulf %131, %131 : vector<16x256xf32>
    %133 = arith.mulf %131, %132 : vector<16x256xf32>
    %cst_60 = arith.constant 4.471500e-02 : f32
    %134 = vector.broadcast %cst_60 : f32 to vector<16x256xf32>
    %135 = arith.mulf %134, %133 : vector<16x256xf32>
    %136 = arith.addf %131, %135 : vector<16x256xf32>
    %cst_61 = arith.constant 0.797884583 : f32
    %137 = vector.broadcast %cst_61 : f32 to vector<16x256xf32>
    %138 = arith.mulf %137, %136 : vector<16x256xf32>
    %139 = math.tanh %138 : vector<16x256xf32>
    %cst_62 = arith.constant 1.000000e+00 : f32
    %140 = vector.broadcast %cst_62 : f32 to vector<16x256xf32>
    %141 = arith.addf %140, %139 : vector<16x256xf32>
    %cst_63 = arith.constant 5.000000e-01 : f32
    %142 = vector.broadcast %cst_63 : f32 to vector<16x256xf32>
    %143 = arith.mulf %142, %141 : vector<16x256xf32>
    %144 = arith.mulf %131, %143 : vector<16x256xf32>
    %145 = arith.truncf %144 : vector<16x256xf32> to vector<16x256xbf16>
    %cst_64 = arith.constant dense<0.000000e+00> : vector<16x128xf32>
    %146 = tpu.matmul %145, %21, %cst_64 {dimension_numbers = #tpu.dot_dimension_numbers<[1], [0], [0], [1], [0, 0, 1, 1], [], []>} : vector<16x256xbf16>, vector<256x128xbf16>, vector<16x128xf32> -> vector<16x128xf32>
    %147 = vector.broadcast %23 : vector<1x128xf32> to vector<16x128xf32>
    %148 = arith.addf %146, %147 : vector<16x128xf32>
    %149 = arith.addf %127, %148 : vector<16x128xf32>
    %150 = vector.extract_strided_slice %7 {offsets = [4, 0, 0], sizes = [1, 1, 128], strides = [1, 1, 1]} : vector<6x1x128xf32> to vector<1x1x128xf32>
    %151 = vector.shape_cast %150 : vector<1x1x128xf32> to vector<1x128xf32>
    %152 = vector.extract_strided_slice %7 {offsets = [5, 0, 0], sizes = [1, 1, 128], strides = [1, 1, 1]} : vector<6x1x128xf32> to vector<1x1x128xf32>
    %153 = vector.shape_cast %152 : vector<1x1x128xf32> to vector<1x128xf32>
    %cst_65 = arith.constant dense<0.000000e+00> : vector<16xf32>
    %154 = vector.multi_reduction <add>, %149, %cst_65 [1] : vector<16x128xf32> to vector<16xf32>
    %155 = vector.shape_cast %154 : vector<16xf32> to vector<16x1xf32>
    %cst_66 = arith.constant 1.280000e+02 : f32
    %156 = vector.broadcast %cst_66 : f32 to vector<16x1xf32>
    %157 = arith.divf %155, %156 : vector<16x1xf32>
    %158 = vector.broadcast %157 : vector<16x1xf32> to vector<16x128xf32>
    %159 = arith.subf %149, %158 : vector<16x128xf32>
    %160 = arith.mulf %159, %159 : vector<16x128xf32>
    %cst_67 = arith.constant dense<0.000000e+00> : vector<16xf32>
    %161 = vector.multi_reduction <add>, %160, %cst_67 [1] : vector<16x128xf32> to vector<16xf32>
    %162 = vector.shape_cast %161 : vector<16xf32> to vector<16x1xf32>
    %cst_68 = arith.constant 1.280000e+02 : f32
    %163 = vector.broadcast %cst_68 : f32 to vector<16x1xf32>
    %164 = arith.divf %162, %163 : vector<16x1xf32>
    %165 = vector.broadcast %157 : vector<16x1xf32> to vector<16x128xf32>
    %166 = arith.subf %149, %165 : vector<16x128xf32>
    %cst_69 = arith.constant 9.99999996E-13 : f32
    %167 = vector.broadcast %cst_69 : f32 to vector<16x1xf32>
    %168 = arith.addf %164, %167 : vector<16x1xf32>
    %169 = math.rsqrt %168 : vector<16x1xf32>
    %170 = vector.broadcast %169 : vector<16x1xf32> to vector<16x128xf32>
    %171 = arith.mulf %166, %170 : vector<16x128xf32>
    %172 = vector.broadcast %151 : vector<1x128xf32> to vector<16x128xf32>
    %173 = arith.mulf %171, %172 : vector<16x128xf32>
    %174 = vector.broadcast %153 : vector<1x128xf32> to vector<16x128xf32>
    %175 = arith.addf %173, %174 : vector<16x128xf32>
    %176 = vector.shape_cast %175 : vector<16x128xf32> to vector<2x8x128xf32>
    %177 = vector.extract_strided_slice %176 {offsets = [0, 0, 0], sizes = [2, 1, 128], strides = [1, 1, 1]} : vector<2x8x128xf32> to vector<2x1x128xf32>
    %178 = vector.shape_cast %177 : vector<2x1x128xf32> to vector<2x128xf32>
    %c0_70 = arith.constant 0 : index
    %c0_71 = arith.constant 0 : index
    %179 = vector.load %arg2[%c0_70, %c0_71] : memref<32x1xi32, #tpu.memory_space<vmem>>, vector<32x1xi32>
    %c0_72 = arith.constant 0 : index
    %c0_73 = arith.constant 0 : index
    %c0_74 = arith.constant 0 : index
    %180 = vector.load %arg3[%c0_72, %c0_73, %c0_74] : memref<4x1x8xf32, #tpu.memory_space<vmem>>, vector<4x1x8xf32>
    %c1 = arith.constant 1 : index
    %c0_75 = arith.constant 0 : index
    %c0_76 = arith.constant 0 : index
    %181 = vector.load %arg4[%c1, %c0_75, %c0_76] : memref<2x128x128xbf16, #tpu.memory_space<vmem>>, vector<1x128x128xbf16>
    %182 = vector.shape_cast %181 : vector<1x128x128xbf16> to vector<128x128xbf16>
    %c1_77 = arith.constant 1 : index
    %c0_78 = arith.constant 0 : index
    %c0_79 = arith.constant 0 : index
    %183 = vector.load %arg5[%c1_77, %c0_78, %c0_79] : memref<2x8x128xf32, #tpu.memory_space<vmem>>, vector<1x8x128xf32>
    %184 = vector.shape_cast %183 : vector<1x8x128xf32> to vector<8x128xf32>
    %c1_80 = arith.constant 1 : index
    %c0_81 = arith.constant 0 : index
    %c0_82 = arith.constant 0 : index
    %c0_83 = arith.constant 0 : index
    %185 = vector.load %arg6[%c1_80, %c0_81, %c0_82, %c0_83] : memref<2x6x1x128xf32, #tpu.memory_space<vmem>>, vector<1x6x1x128xf32>
    %186 = vector.shape_cast %185 : vector<1x6x1x128xf32> to vector<6x1x128xf32>
    %c1_84 = arith.constant 1 : index
    %c0_85 = arith.constant 0 : index
    %c0_86 = arith.constant 0 : index
    %187 = vector.load %arg7[%c1_84, %c0_85, %c0_86] : memref<2x128x384xbf16, #tpu.memory_space<vmem>>, vector<1x128x384xbf16>
    %188 = vector.shape_cast %187 : vector<1x128x384xbf16> to vector<128x384xbf16>
    %c1_87 = arith.constant 1 : index
    %c0_88 = arith.constant 0 : index
    %c0_89 = arith.constant 0 : index
    %189 = vector.load %arg8[%c1_87, %c0_88, %c0_89] : memref<2x1x384xf32, #tpu.memory_space<vmem>>, vector<1x1x384xf32>
    %190 = vector.shape_cast %189 : vector<1x1x384xf32> to vector<1x384xf32>
    %c1_90 = arith.constant 1 : index
    %c0_91 = arith.constant 0 : index
    %c0_92 = arith.constant 0 : index
    %191 = vector.load %arg9[%c1_90, %c0_91, %c0_92] : memref<2x128x128xbf16, #tpu.memory_space<vmem>>, vector<1x128x128xbf16>
    %192 = vector.shape_cast %191 : vector<1x128x128xbf16> to vector<128x128xbf16>
    %c1_93 = arith.constant 1 : index
    %c0_94 = arith.constant 0 : index
    %c0_95 = arith.constant 0 : index
    %193 = vector.load %arg10[%c1_93, %c0_94, %c0_95] : memref<2x1x128xf32, #tpu.memory_space<vmem>>, vector<1x1x128xf32>
    %194 = vector.shape_cast %193 : vector<1x1x128xf32> to vector<1x128xf32>
    %c1_96 = arith.constant 1 : index
    %c0_97 = arith.constant 0 : index
    %c0_98 = arith.constant 0 : index
    %195 = vector.load %arg11[%c1_96, %c0_97, %c0_98] : memref<2x128x256xbf16, #tpu.memory_space<vmem>>, vector<1x128x256xbf16>
    %196 = vector.shape_cast %195 : vector<1x128x256xbf16> to vector<128x256xbf16>
    %c1_99 = arith.constant 1 : index
    %c0_100 = arith.constant 0 : index
    %c0_101 = arith.constant 0 : index
    %197 = vector.load %arg12[%c1_99, %c0_100, %c0_101] : memref<2x1x256xf32, #tpu.memory_space<vmem>>, vector<1x1x256xf32>
    %198 = vector.shape_cast %197 : vector<1x1x256xf32> to vector<1x256xf32>
    %c1_102 = arith.constant 1 : index
    %c0_103 = arith.constant 0 : index
    %c0_104 = arith.constant 0 : index
    %199 = vector.load %arg13[%c1_102, %c0_103, %c0_104] : memref<2x256x128xbf16, #tpu.memory_space<vmem>>, vector<1x256x128xbf16>
    %200 = vector.shape_cast %199 : vector<1x256x128xbf16> to vector<256x128xbf16>
    %c1_105 = arith.constant 1 : index
    %c0_106 = arith.constant 0 : index
    %c0_107 = arith.constant 0 : index
    %201 = vector.load %arg14[%c1_105, %c0_106, %c0_107] : memref<2x1x128xf32, #tpu.memory_space<vmem>>, vector<1x1x128xf32>
    %202 = vector.shape_cast %201 : vector<1x1x128xf32> to vector<1x128xf32>
    %203 = tpu.iota {dimensions = array<i32: 1>} : vector<32x128xi32>
    %204 = vector.broadcast %179 : vector<32x1xi32> to vector<32x128xi32>
    %205 = arith.cmpi eq, %204, %203 : vector<32x128xi32>
    %cst_108 = arith.constant 1.000000e+00 : f32
    %cst_109 = arith.constant 0.000000e+00 : f32
    %206 = vector.broadcast %cst_108 : f32 to vector<32x128xf32>
    %207 = vector.broadcast %cst_109 : f32 to vector<32x128xf32>
    %208 = arith.select %205, %206, %207 : vector<32x128xi1>, vector<32x128xf32>
    %209 = arith.truncf %208 : vector<32x128xf32> to vector<32x128xbf16>
    %cst_110 = arith.constant dense<0.000000e+00> : vector<32x128xf32>
    %210 = tpu.matmul %209, %182, %cst_110 {dimension_numbers = #tpu.dot_dimension_numbers<[1], [0], [0], [1], [0, 0, 1, 1], [], []>} : vector<32x128xbf16>, vector<128x128xbf16>, vector<32x128xf32> -> vector<32x128xf32>
    %211 = vector.shape_cast %210 : vector<32x128xf32> to vector<4x8x128xf32>
    %212 = vector.shape_cast %184 : vector<8x128xf32> to vector<1x8x128xf32>
    %213 = vector.broadcast %212 : vector<1x8x128xf32> to vector<4x8x128xf32>
    %214 = arith.addf %211, %213 : vector<4x8x128xf32>
    %215 = vector.extract_strided_slice %186 {offsets = [0, 0, 0], sizes = [1, 1, 128], strides = [1, 1, 1]} : vector<6x1x128xf32> to vector<1x1x128xf32>
    %216 = vector.shape_cast %215 : vector<1x1x128xf32> to vector<1x128xf32>
    %217 = vector.extract_strided_slice %186 {offsets = [1, 0, 0], sizes = [1, 1, 128], strides = [1, 1, 1]} : vector<6x1x128xf32> to vector<1x1x128xf32>
    %218 = vector.shape_cast %217 : vector<1x1x128xf32> to vector<1x128xf32>
    %cst_111 = arith.constant dense<0.000000e+00> : vector<4x8xf32>
    %219 = vector.multi_reduction <add>, %214, %cst_111 [2] : vector<4x8x128xf32> to vector<4x8xf32>
    %220 = vector.shape_cast %219 : vector<4x8xf32> to vector<4x8x1xf32>
    %cst_112 = arith.constant 1.280000e+02 : f32
    %221 = vector.broadcast %cst_112 : f32 to vector<4x8x1xf32>
    %222 = arith.divf %220, %221 : vector<4x8x1xf32>
    %223 = vector.broadcast %222 : vector<4x8x1xf32> to vector<4x8x128xf32>
    %224 = arith.subf %214, %223 : vector<4x8x128xf32>
    %225 = arith.mulf %224, %224 : vector<4x8x128xf32>
    %cst_113 = arith.constant dense<0.000000e+00> : vector<4x8xf32>
    %226 = vector.multi_reduction <add>, %225, %cst_113 [2] : vector<4x8x128xf32> to vector<4x8xf32>
    %227 = vector.shape_cast %226 : vector<4x8xf32> to vector<4x8x1xf32>
    %cst_114 = arith.constant 1.280000e+02 : f32
    %228 = vector.broadcast %cst_114 : f32 to vector<4x8x1xf32>
    %229 = arith.divf %227, %228 : vector<4x8x1xf32>
    %230 = vector.broadcast %222 : vector<4x8x1xf32> to vector<4x8x128xf32>
    %231 = arith.subf %214, %230 : vector<4x8x128xf32>
    %cst_115 = arith.constant 9.99999996E-13 : f32
    %232 = vector.broadcast %cst_115 : f32 to vector<4x8x1xf32>
    %233 = arith.addf %229, %232 : vector<4x8x1xf32>
    %234 = math.rsqrt %233 : vector<4x8x1xf32>
    %235 = vector.broadcast %234 : vector<4x8x1xf32> to vector<4x8x128xf32>
    %236 = arith.mulf %231, %235 : vector<4x8x128xf32>
    %237 = vector.shape_cast %216 : vector<1x128xf32> to vector<1x1x128xf32>
    %238 = vector.broadcast %237 : vector<1x1x128xf32> to vector<4x8x128xf32>
    %239 = arith.mulf %236, %238 : vector<4x8x128xf32>
    %240 = vector.shape_cast %218 : vector<1x128xf32> to vector<1x1x128xf32>
    %241 = vector.broadcast %240 : vector<1x1x128xf32> to vector<4x8x128xf32>
    %242 = arith.addf %239, %241 : vector<4x8x128xf32>
    %243 = vector.shape_cast %242 : vector<4x8x128xf32> to vector<32x128xf32>
    %244 = arith.truncf %243 : vector<32x128xf32> to vector<32x128xbf16>
    %cst_116 = arith.constant dense<0.000000e+00> : vector<32x384xf32>
    %245 = tpu.matmul %244, %188, %cst_116 {dimension_numbers = #tpu.dot_dimension_numbers<[1], [0], [0], [1], [0, 0, 1, 1], [], []>} : vector<32x128xbf16>, vector<128x384xbf16>, vector<32x384xf32> -> vector<32x384xf32>
    %246 = vector.broadcast %190 : vector<1x384xf32> to vector<32x384xf32>
    %247 = arith.addf %245, %246 : vector<32x384xf32>
    %248 = arith.truncf %247 : vector<32x384xf32> to vector<32x384xbf16>
    %249 = vector.extract_strided_slice %248 {offsets = [0, 0], sizes = [32, 128], strides = [1, 1]} : vector<32x384xbf16> to vector<32x128xbf16>
    %250 = vector.shape_cast %249 : vector<32x128xbf16> to vector<4x8x128xbf16>
    %251 = vector.extract_strided_slice %248 {offsets = [0, 128], sizes = [32, 128], strides = [1, 1]} : vector<32x384xbf16> to vector<32x128xbf16>
    %252 = vector.shape_cast %251 : vector<32x128xbf16> to vector<4x8x128xbf16>
    %253 = vector.extract_strided_slice %248 {offsets = [0, 256], sizes = [32, 128], strides = [1, 1]} : vector<32x384xbf16> to vector<32x128xbf16>
    %254 = vector.shape_cast %253 : vector<32x128xbf16> to vector<4x8x128xbf16>
    "tpu.trace_start"() <{level = 10 : i32, message = "bqd,bkd->bqk"}> : () -> ()
    %cst_117 = arith.constant dense<0.000000e+00> : vector<4x8x8xf32>
    %255 = tpu.matmul %250, %252, %cst_117 {dimension_numbers = #tpu.dot_dimension_numbers<[2], [2], [1], [1], [0, 0, 0, 1, 1, 1], [0], [0]>} : vector<4x8x128xbf16>, vector<4x8x128xbf16>, vector<4x8x8xf32> -> vector<4x8x8xf32>
    "tpu.trace_stop"() : () -> ()
    %cst_118 = arith.constant 0.0883883461 : f32
    %256 = vector.broadcast %cst_118 : f32 to vector<4x8x8xf32>
    %257 = arith.mulf %255, %256 : vector<4x8x8xf32>
    %cst_119 = arith.constant 1.000000e+00 : f32
    %258 = vector.broadcast %cst_119 : f32 to vector<4x1x8xf32>
    %259 = arith.subf %258, %180 : vector<4x1x8xf32>
    %cst_120 = arith.constant -1.000000e+09 : f32
    %260 = vector.broadcast %cst_120 : f32 to vector<4x1x8xf32>
    %261 = arith.mulf %259, %260 : vector<4x1x8xf32>
    %262 = vector.broadcast %261 : vector<4x1x8xf32> to vector<4x8x8xf32>
    %263 = arith.addf %257, %262 : vector<4x8x8xf32>
    %cst_121 = arith.constant dense<0xFF800000> : vector<4x8xf32>
    %264 = vector.multi_reduction <maximumf>, %263, %cst_121 [2] : vector<4x8x8xf32> to vector<4x8xf32>
    %265 = vector.shape_cast %264 : vector<4x8xf32> to vector<4x8x1xf32>
    %266 = vector.broadcast %265 : vector<4x8x1xf32> to vector<4x8x8xf32>
    %267 = arith.subf %263, %266 : vector<4x8x8xf32>
    %268 = math.exp %267 : vector<4x8x8xf32>
    %cst_122 = arith.constant dense<0.000000e+00> : vector<4x8xf32>
    %269 = vector.multi_reduction <add>, %268, %cst_122 [2] : vector<4x8x8xf32> to vector<4x8xf32>
    %270 = vector.shape_cast %269 : vector<4x8xf32> to vector<4x8x1xf32>
    %271 = vector.broadcast %270 : vector<4x8x1xf32> to vector<4x8x8xf32>
    %272 = arith.divf %268, %271 : vector<4x8x8xf32>
    %273 = arith.truncf %272 : vector<4x8x8xf32> to vector<4x8x8xbf16>
    "tpu.trace_start"() <{level = 10 : i32, message = "bqk,bkd->bqd"}> : () -> ()
    %cst_123 = arith.constant dense<0.000000e+00> : vector<4x8x128xf32>
    %274 = tpu.matmul %273, %254, %cst_123 {dimension_numbers = #tpu.dot_dimension_numbers<[2], [1], [1], [2], [0, 0, 0, 1, 1, 2], [0], [0]>} : vector<4x8x8xbf16>, vector<4x8x128xbf16>, vector<4x8x128xf32> -> vector<4x8x128xf32>
    "tpu.trace_stop"() : () -> ()
    %275 = vector.shape_cast %274 : vector<4x8x128xf32> to vector<32x128xf32>
    %276 = arith.truncf %275 : vector<32x128xf32> to vector<32x128xbf16>
    %cst_124 = arith.constant dense<0.000000e+00> : vector<32x128xf32>
    %277 = tpu.matmul %276, %192, %cst_124 {dimension_numbers = #tpu.dot_dimension_numbers<[1], [0], [0], [1], [0, 0, 1, 1], [], []>} : vector<32x128xbf16>, vector<128x128xbf16>, vector<32x128xf32> -> vector<32x128xf32>
    %278 = vector.broadcast %194 : vector<1x128xf32> to vector<32x128xf32>
    %279 = arith.addf %277, %278 : vector<32x128xf32>
    %280 = arith.addf %243, %279 : vector<32x128xf32>
    %281 = vector.extract_strided_slice %186 {offsets = [2, 0, 0], sizes = [1, 1, 128], strides = [1, 1, 1]} : vector<6x1x128xf32> to vector<1x1x128xf32>
    %282 = vector.shape_cast %281 : vector<1x1x128xf32> to vector<1x128xf32>
    %283 = vector.extract_strided_slice %186 {offsets = [3, 0, 0], sizes = [1, 1, 128], strides = [1, 1, 1]} : vector<6x1x128xf32> to vector<1x1x128xf32>
    %284 = vector.shape_cast %283 : vector<1x1x128xf32> to vector<1x128xf32>
    %cst_125 = arith.constant dense<0.000000e+00> : vector<32xf32>
    %285 = vector.multi_reduction <add>, %280, %cst_125 [1] : vector<32x128xf32> to vector<32xf32>
    %286 = vector.shape_cast %285 : vector<32xf32> to vector<32x1xf32>
    %cst_126 = arith.constant 1.280000e+02 : f32
    %287 = vector.broadcast %cst_126 : f32 to vector<32x1xf32>
    %288 = arith.divf %286, %287 : vector<32x1xf32>
    %289 = vector.broadcast %288 : vector<32x1xf32> to vector<32x128xf32>
    %290 = arith.subf %280, %289 : vector<32x128xf32>
    %291 = arith.mulf %290, %290 : vector<32x128xf32>
    %cst_127 = arith.constant dense<0.000000e+00> : vector<32xf32>
    %292 = vector.multi_reduction <add>, %291, %cst_127 [1] : vector<32x128xf32> to vector<32xf32>
    %293 = vector.shape_cast %292 : vector<32xf32> to vector<32x1xf32>
    %cst_128 = arith.constant 1.280000e+02 : f32
    %294 = vector.broadcast %cst_128 : f32 to vector<32x1xf32>
    %295 = arith.divf %293, %294 : vector<32x1xf32>
    %296 = vector.broadcast %288 : vector<32x1xf32> to vector<32x128xf32>
    %297 = arith.subf %280, %296 : vector<32x128xf32>
    %cst_129 = arith.constant 9.99999996E-13 : f32
    %298 = vector.broadcast %cst_129 : f32 to vector<32x1xf32>
    %299 = arith.addf %295, %298 : vector<32x1xf32>
    %300 = math.rsqrt %299 : vector<32x1xf32>
    %301 = vector.broadcast %300 : vector<32x1xf32> to vector<32x128xf32>
    %302 = arith.mulf %297, %301 : vector<32x128xf32>
    %303 = vector.broadcast %282 : vector<1x128xf32> to vector<32x128xf32>
    %304 = arith.mulf %302, %303 : vector<32x128xf32>
    %305 = vector.broadcast %284 : vector<1x128xf32> to vector<32x128xf32>
    %306 = arith.addf %304, %305 : vector<32x128xf32>
    %307 = arith.truncf %306 : vector<32x128xf32> to vector<32x128xbf16>
    %cst_130 = arith.constant dense<0.000000e+00> : vector<32x256xf32>
    %308 = tpu.matmul %307, %196, %cst_130 {dimension_numbers = #tpu.dot_dimension_numbers<[1], [0], [0], [1], [0, 0, 1, 1], [], []>} : vector<32x128xbf16>, vector<128x256xbf16>, vector<32x256xf32> -> vector<32x256xf32>
    %309 = vector.broadcast %198 : vector<1x256xf32> to vector<32x256xf32>
    %310 = arith.addf %308, %309 : vector<32x256xf32>
    %311 = arith.mulf %310, %310 : vector<32x256xf32>
    %312 = arith.mulf %310, %311 : vector<32x256xf32>
    %cst_131 = arith.constant 4.471500e-02 : f32
    %313 = vector.broadcast %cst_131 : f32 to vector<32x256xf32>
    %314 = arith.mulf %313, %312 : vector<32x256xf32>
    %315 = arith.addf %310, %314 : vector<32x256xf32>
    %cst_132 = arith.constant 0.797884583 : f32
    %316 = vector.broadcast %cst_132 : f32 to vector<32x256xf32>
    %317 = arith.mulf %316, %315 : vector<32x256xf32>
    %318 = math.tanh %317 : vector<32x256xf32>
    %cst_133 = arith.constant 1.000000e+00 : f32
    %319 = vector.broadcast %cst_133 : f32 to vector<32x256xf32>
    %320 = arith.addf %319, %318 : vector<32x256xf32>
    %cst_134 = arith.constant 5.000000e-01 : f32
    %321 = vector.broadcast %cst_134 : f32 to vector<32x256xf32>
    %322 = arith.mulf %321, %320 : vector<32x256xf32>
    %323 = arith.mulf %310, %322 : vector<32x256xf32>
    %324 = arith.truncf %323 : vector<32x256xf32> to vector<32x256xbf16>
    %cst_135 = arith.constant dense<0.000000e+00> : vector<32x128xf32>
    %325 = tpu.matmul %324, %200, %cst_135 {dimension_numbers = #tpu.dot_dimension_numbers<[1], [0], [0], [1], [0, 0, 1, 1], [], []>} : vector<32x256xbf16>, vector<256x128xbf16>, vector<32x128xf32> -> vector<32x128xf32>
    %326 = vector.broadcast %202 : vector<1x128xf32> to vector<32x128xf32>
    %327 = arith.addf %325, %326 : vector<32x128xf32>
    %328 = arith.addf %306, %327 : vector<32x128xf32>
    %329 = vector.extract_strided_slice %186 {offsets = [4, 0, 0], sizes = [1, 1, 128], strides = [1, 1, 1]} : vector<6x1x128xf32> to vector<1x1x128xf32>
    %330 = vector.shape_cast %329 : vector<1x1x128xf32> to vector<1x128xf32>
    %331 = vector.extract_strided_slice %186 {offsets = [5, 0, 0], sizes = [1, 1, 128], strides = [1, 1, 1]} : vector<6x1x128xf32> to vector<1x1x128xf32>
    %332 = vector.shape_cast %331 : vector<1x1x128xf32> to vector<1x128xf32>
    %cst_136 = arith.constant dense<0.000000e+00> : vector<32xf32>
    %333 = vector.multi_reduction <add>, %328, %cst_136 [1] : vector<32x128xf32> to vector<32xf32>
    %334 = vector.shape_cast %333 : vector<32xf32> to vector<32x1xf32>
    %cst_137 = arith.constant 1.280000e+02 : f32
    %335 = vector.broadcast %cst_137 : f32 to vector<32x1xf32>
    %336 = arith.divf %334, %335 : vector<32x1xf32>
    %337 = vector.broadcast %336 : vector<32x1xf32> to vector<32x128xf32>
    %338 = arith.subf %328, %337 : vector<32x128xf32>
    %339 = arith.mulf %338, %338 : vector<32x128xf32>
    %cst_138 = arith.constant dense<0.000000e+00> : vector<32xf32>
    %340 = vector.multi_reduction <add>, %339, %cst_138 [1] : vector<32x128xf32> to vector<32xf32>
    %341 = vector.shape_cast %340 : vector<32xf32> to vector<32x1xf32>
    %cst_139 = arith.constant 1.280000e+02 : f32
    %342 = vector.broadcast %cst_139 : f32 to vector<32x1xf32>
    %343 = arith.divf %341, %342 : vector<32x1xf32>
    %344 = vector.broadcast %336 : vector<32x1xf32> to vector<32x128xf32>
    %345 = arith.subf %328, %344 : vector<32x128xf32>
    %cst_140 = arith.constant 9.99999996E-13 : f32
    %346 = vector.broadcast %cst_140 : f32 to vector<32x1xf32>
    %347 = arith.addf %343, %346 : vector<32x1xf32>
    %348 = math.rsqrt %347 : vector<32x1xf32>
    %349 = vector.broadcast %348 : vector<32x1xf32> to vector<32x128xf32>
    %350 = arith.mulf %345, %349 : vector<32x128xf32>
    %351 = vector.broadcast %330 : vector<1x128xf32> to vector<32x128xf32>
    %352 = arith.mulf %350, %351 : vector<32x128xf32>
    %353 = vector.broadcast %332 : vector<1x128xf32> to vector<32x128xf32>
    %354 = arith.addf %352, %353 : vector<32x128xf32>
    %355 = vector.shape_cast %354 : vector<32x128xf32> to vector<4x8x128xf32>
    %356 = vector.extract_strided_slice %355 {offsets = [0, 0, 0], sizes = [4, 1, 128], strides = [1, 1, 1]} : vector<4x8x128xf32> to vector<4x1x128xf32>
    %357 = vector.shape_cast %356 : vector<4x1x128xf32> to vector<4x128xf32>
    %cst_141 = arith.constant dense<0.000000e+00> : vector<2x4xf32>
    %358 = tpu.matmul %178, %357, %cst_141 {dimension_numbers = #tpu.dot_dimension_numbers<[1], [1], [0], [0], [0, 0, 1, 0], [], []>} : vector<2x128xf32>, vector<4x128xf32>, vector<2x4xf32> -> vector<2x4xf32>
    %c0_142 = arith.constant 0 : index
    %c0_143 = arith.constant 0 : index
    %359 = vector.load %arg15[%c0_142, %c0_143] : memref<2x4xf32, #tpu.memory_space<vmem>>, vector<2x4xf32>
    tpu.vector_store %arg15[%c0_142, %c0_143], %358 {strides = array<i32>} : memref<2x4xf32, #tpu.memory_space<vmem>>, vector<2x4xf32>,
    %360 = tpu.iota {dimensions = array<i32: 1>} : vector<2x4xi32>
    %361 = tpu.iota {dimensions = array<i32: 0>} : vector<2x4xi32>
    %c2_i32 = arith.constant 2 : i32
    %362 = vector.broadcast %c2_i32 : i32 to vector<2x4xi32>
    %363 = arith.muli %361, %362 : vector<2x4xi32>
    %364 = arith.cmpi eq, %360, %363 : vector<2x4xi32>
    %cst_144 = arith.constant dense<0xFF800000> : vector<2xf32>
    %365 = vector.multi_reduction <maximumf>, %358, %cst_144 [1] : vector<2x4xf32> to vector<2xf32>
    %366 = vector.shape_cast %365 : vector<2xf32> to vector<2x1xf32>
    %367 = vector.broadcast %366 : vector<2x1xf32> to vector<2x4xf32>
    %368 = arith.subf %358, %367 : vector<2x4xf32>
    %369 = math.exp %368 : vector<2x4xf32>
    %cst_145 = arith.constant dense<0.000000e+00> : vector<2xf32>
    %370 = vector.multi_reduction <add>, %369, %cst_145 [1] : vector<2x4xf32> to vector<2xf32>
    %371 = vector.shape_cast %370 : vector<2xf32> to vector<2x1xf32>
    %372 = math.log %371 : vector<2x1xf32>
    %373 = arith.addf %366, %372 : vector<2x1xf32>
    %cst_146 = arith.constant 0.000000e+00 : f32
    %374 = vector.broadcast %cst_146 : f32 to vector<2x4xf32>
    %375 = arith.select %364, %358, %374 : vector<2x4xi1>, vector<2x4xf32>
    %cst_147 = arith.constant dense<0.000000e+00> : vector<2xf32>
    %376 = vector.multi_reduction <add>, %375, %cst_147 [1] : vector<2x4xf32> to vector<2xf32>
    %377 = vector.shape_cast %376 : vector<2xf32> to vector<2x1xf32>
    %378 = arith.subf %373, %377 : vector<2x1xf32>
    %cst_148 = arith.constant dense<0.000000e+00> : vector<1xf32>
    %379 = vector.multi_reduction <add>, %378, %cst_148 [0] : vector<2x1xf32> to vector<1xf32>
    %380 = vector.shape_cast %379 : vector<1xf32> to vector<1x1xf32>
    %cst_149 = arith.constant 5.000000e-01 : f32
    %381 = vector.broadcast %cst_149 : f32 to vector<1x1xf32>
    %382 = arith.mulf %380, %381 : vector<1x1xf32>
    %c0_150 = arith.constant 0 : index
    %c0_151 = arith.constant 0 : index
    %383 = vector.load %arg16[%c0_150, %c0_151] : memref<1x1xf32, #tpu.memory_space<vmem>>, vector<1x1xf32>
    tpu.vector_store %arg16[%c0_150, %c0_151], %382 {strides = array<i32>} : memref<1x1xf32, #tpu.memory_space<vmem>>, vector<1x1xf32>,
    return
  }
}

</mosaic_0001>

<bundles_post_ra>
// kernel: _fused_forward.1
= control target key start
LH: loop header
LB: loop body
LE: loop exit
PB: predicated region body
PF: predicated region fallthrough
CT: control target
= control target key end

     0   :  { %s5013_s0 = inlined_call_operand.vmem [shape: s32[16,1], index: 0, kind: input, shape index: {}]   ;;  %s5014_s1 = inlined_call_operand.vmem [shape: f32[2,1,8], index: 1, kind: input, shape index: {}]   ;;  %s5015_s2 = inlined_call_operand.vmem [shape: s32[32,1], index: 2, kind: input, shape index: {}]   ;;  %s5016_s3 = inlined_call_operand.vmem [shape: f32[4,1,8], index: 3, kind: input, shape index: {}]   ;;  %s5017_s4 = inlined_call_operand.vmem [shape: bf16[2,128,128], index: 4, kind: input, shape index: {}]   ;;  %s5018_s5 = inlined_call_operand.vmem [shape: f32[2,8,128], index: 5, kind: input, shape index: {}]   ;;  %s5019_s6 = inlined_call_operand.vmem [shape: f32[2,6,1,128], index: 6, kind: input, shape index: {}]   ;;  %s5020_s7 = inlined_call_operand.vmem [shape: bf16[2,128,384], index: 7, kind: input, shape index: {}]   ;;  %s5021_s8 = inlined_call_operand.vmem [shape: f32[2,1,384], index: 8, kind: input, shape index: {}]   ;;  %s5022_s9 = inlined_call_operand.vmem [shape: bf16[2,128,128], index: 9, kind: input, shape index: {}]   ;;  %s5023_s10 = inlined_call_operand.vmem [shape: f32[2,1,128], index: 10, kind: input, shape index: {}]   ;;  %s5024_s11 = inlined_call_operand.vmem [shape: bf16[2,128,256], index: 11, kind: input, shape index: {}]   ;;  %s5025_s12 = inlined_call_operand.vmem [shape: f32[2,1,256], index: 12, kind: input, shape index: {}]   ;;  %s5026_s13 = inlined_call_operand.vmem [shape: bf16[2,256,128], index: 13, kind: input, shape index: {}]   ;;  %s5027_s14 = inlined_call_operand.vmem [shape: f32[2,1,128], index: 14, kind: input, shape index: {}]   ;;  %s5028_s15 = inlined_call_operand.hbm [shape: f32[2,4], index: 15, kind: output, shape index: {0}]   ;;  %s5029_s16 = inlined_call_operand.hbm [shape: f32[1,1], index: 16, kind: output, shape index: {1}]  }
   0x1   :  { %5031 = sst [smem:[#allocation8_spill]] %s5013_s0 }
   0x2   :  { %22 = vsyncpa [#allocation3], 0  ;;  %s5032_s23 = sld [smem:[#allocation8_spill]]  ;;  %v4081_v1 = vmov 0   ;;  %v4082_v2 = vmov 0.0   ;;  %v3773_v3 = vld [vmem:[%s5017_s4 + $0x38] sm:$0xff]  }
   0x3   :  { %3771 = vset.pattern.permute.xlu0 %v4081_v1  ;;  %3568 = vmatprep.subr.bf16.mxu0 %v4082_v2  ;;  %v3774_v5 = vld [vmem:[%s5017_s4 + $0x30] sm:$0xff]   ;;  %vm4083_vm0 = vmmov 0   ;;  %v3775_v6 = vld [vmem:[%s5017_s4 + $0x28] sm:$0xff]   ;;  %v3776_v7 = vld [vmem:[%s5017_s4 + $0x20] sm:$0xff]  }
   0x4   :  { %502 = vmatprep.mubr.bf16.mxu1 %v4081_v1  ;;  %3569 = vmatpush3.bf16.msra.mxu0 %v3773_v3  ;;  %v3777_v8 = vld [vmem:[%s5017_s4 + $0x18] sm:$0xff]   ;;  %v3778_v9 = vld [vmem:[%s5017_s4 + $0x10] sm:$0xff]   ;;  %v3779_v10 = vld [vmem:[%s5017_s4 + $0x8] sm:$0xff]  }
   0x5   :  { %3772 = vset.pattern.permute.xlu1 %v4081_v1  ;;  %3570 = vmatprep.subr.bf16.mxu0 %v4082_v2  ;;  %v3780_v11 = vld [vmem:[%s5017_s4] sm:$0xff]  }
   0x6   :  { %3584 = vmatprep.mubr.msk.bf16.mxu0 %vm4083_vm0, %v4082_v2 }
   0x8   :  { %v55_v0 = vld [vmem:[%s5032_s23] sm:$0xff]  ;;  %v56_v4 = vld [vmem:[%s5032_s23 + $0x8] sm:$0xff]  ;;  %3571 = vmatpush3.bf16.msra.mxu0 %v3774_v5 }
   0x9   :  { %185 = vperm.xlu0 %3771, %v55_v0   ;;  %3572 = vmatprep.subr.bf16.mxu0 %v4082_v2 }
   0xc   :  { %3573 = vmatpush3.bf16.msra.mxu0 %v3775_v6 }
   0xd   :  { %188 = vperm.xlu0 %3771, %v56_v4   ;;  %3574 = vmatprep.subr.bf16.mxu0 %v4082_v2 }
  0x10   :  { %3575 = vmatpush3.bf16.msra.mxu0 %v3776_v7 }
  0x11   :  { %3576 = vmatprep.subr.bf16.mxu0 %v4082_v2 }
  0x14   :  { %3577 = vmatpush3.bf16.msra.mxu0 %v3777_v8 }
  0x15   :  { %3578 = vmatprep.subr.bf16.mxu0 %v4082_v2 }
  0x18   :  { %3579 = vmatpush3.bf16.msra.mxu0 %v3778_v9 }
  0x19   :  { %3580 = vmatprep.subr.bf16.mxu0 %v4082_v2 }
  0x1c   :  { %3581 = vmatpush3.bf16.msra.mxu0 %v3779_v10 }
  0x1d   :  { %3582 = vmatprep.subr.bf16.mxu0 %v4082_v2 }
  0x20   :  { %3583 = vmatpush3.bf16.msra.mxu0 %v3780_v11 }
  0x21   :  { %3588 = vmatprep.subr.bf16.mxu0 %v4082_v2 }
  0x22   :  { %23 = vsyncpa [#allocation5], 0  ;;  %v182_v12 = vlaneseq  ;;  %v4084_v16 = vmov 1.0|1.0   ;;  %v75_v17 = vld [vmem:[%s5018_s5] sm:$0xff]  ;;  %vm704_vm4 = vcmask 1043456  }
  0x23   :  { %v3781_v24 = vld [vmem:[%s5020_s7 + $0xac] ss:$12 sps:$4 sm:$0xff]   ;;  %v3783_v25 = vld [vmem:[%s5020_s7 + $0xa8] ss:$12 sps:$4 sm:$0xff]   ;;  %v3784_v26 = vld [vmem:[%s5020_s7 + $0xb0] ss:$12 sps:$4 sm:$0xff]  }
  0x24   :  { %v4217_v14 = vand.u32 127, %v182_v12  ;;  %470 = vmatprep.subr.bf16.mxu1 %v3781_v24  ;;  %v3785_v35 = vld [vmem:[%s5020_s7 + $0x94] ss:$12 sps:$4 sm:$0xff]   ;;  %v3787_v36 = vld [vmem:[%s5020_s7 + $0x90] ss:$12 sps:$4 sm:$0xff]   ;;  %v4335_v11 = vshrl.u32 %v182_v12, 7 }
  0x25   :  { %471 = vmatpush1.bf16.msra.mxu1 %v3783_v25  ;;  %v3788_v37 = vld [vmem:[%s5020_s7 + $0x98] ss:$12 sps:$4 sm:$0xff]   ;;  %v3789_v38 = vld [vmem:[%s5020_s7 + $0x7c] ss:$12 sps:$4 sm:$0xff]   ;;  %v3792_v40 = vld [vmem:[%s5020_s7 + $0x80] ss:$12 sps:$4 sm:$0xff]  }
  0x26   :  { %472 = vmatprep.subr.bf16.mxu1 %v3785_v35  ;;  %v3791_v39 = vld [vmem:[%s5020_s7 + $0x78] ss:$12 sps:$4 sm:$0xff]   ;;  %v3795_v42 = vld [vmem:[%s5020_s7 + $0x60] ss:$12 sps:$4 sm:$0xff]   ;;  %v3796_v43 = vld [vmem:[%s5020_s7 + $0x68] ss:$12 sps:$4 sm:$0xff]  }
  0x27   :  { %v3793_v41 = vld [vmem:[%s5020_s7 + $0x64] ss:$12 sps:$4 sm:$0xff]   ;;  %v3797_v44 = vld [vmem:[%s5020_s7 + $0x4c] ss:$12 sps:$4 sm:$0xff]   ;;  %v3799_v45 = vld [vmem:[%s5020_s7 + $0x48] ss:$12 sps:$4 sm:$0xff]  }
  0x28   :  { %v3800_v46 = vld [vmem:[%s5020_s7 + $0x50] ss:$12 sps:$4 sm:$0xff]   ;;  %v3801_v47 = vld [vmem:[%s5020_s7 + $0x34] ss:$12 sps:$4 sm:$0xff]   ;;  %v3804_v49 = vld [vmem:[%s5020_s7 + $0x38] ss:$12 sps:$4 sm:$0xff]  }
  0x29   :  { %473 = vmatpush1.bf16.msra.mxu1 %v3787_v36  ;;  %v3803_v48 = vld [vmem:[%s5020_s7 + $0x30] ss:$12 sps:$4 sm:$0xff]   ;;  %v3807_v51 = vld [vmem:[%s5020_s7 + $0x18] ss:$12 sps:$4 sm:$0xff]   ;;  %v3808_v52 = vld [vmem:[%s5020_s7 + $0x20] ss:$12 sps:$4 sm:$0xff]  }
  0x2a   :  { %474 = vmatprep.subr.bf16.mxu1 %v3789_v38  ;;  %v3805_v50 = vld [vmem:[%s5020_s7 + $0x1c] ss:$12 sps:$4 sm:$0xff]   ;;  %v3809_v53 = vld [vmem:[%s5020_s7 + $0x4] ss:$12 sps:$4 sm:$0xff]   ;;  %v3811_v54 = vld [vmem:[%s5020_s7] ss:$12 sps:$4 sm:$0xff]  }
  0x2b   :  { %v3812_v55 = vld [vmem:[%s5020_s7 + $0x8] ss:$12 sps:$4 sm:$0xff]   ;;  %v3114_v0 = vld [vmem:[%s5019_s6] ss:$0 sm:$0xff]  ;;  %v3115_v6 = vld [vmem:[%s5019_s6 + $0x1] ss:$0 sm:$0xff] }
  0x2c   :  { %vm676_vm5 = vcmask 64512   ;;  %vm2956_vm12 = vcmask 1041409   ;;  %vm2966_vm13 = vcmask 1042434   ;;  %vm2969_vm14 = vcmask 1043459  }
  0x2d   :  { %475 = vmatpush1.bf16.msra.mxu1 %v3791_v39  ;;  %vm3042_vm15 = vcmask 25600  }
  0x2e   :  { %476 = vmatprep.subr.bf16.mxu1 %v3793_v41  ;;  %v57_v41 = vld [vmem:[%s5014_s1] sm:$0x1] }
  0x31   :  { %477 = vmatpush1.bf16.msra.mxu1 %v3795_v42  ;;  %v658_v42 = vsub.f32 1.0, %v57_v41 }
  0x32   :  { %478 = vmatprep.subr.bf16.mxu1 %v3797_v44 }
  0x33   :  { %v660_v44 = vmul.f32 -1e+09, %v658_v42 }
  0x35   :  { %479 = vmatpush1.bf16.msra.mxu1 %v3799_v45 }
  0x36   :  { %480 = vmatprep.subr.bf16.mxu1 %v3801_v47 }
  0x39   :  { %481 = vmatpush1.bf16.msra.mxu1 %v3803_v48 }
  0x3a   :  { %482 = vmatprep.subr.bf16.mxu1 %v3805_v50 }
  0x3d   :  { %483 = vmatpush1.bf16.msra.mxu1 %v3807_v51 }
  0x3e   :  { %484 = vmatprep.subr.bf16.mxu1 %v3809_v53 }
  0x41   :  { %485 = vmatpush1.bf16.msra.mxu1 %v3811_v54 }
  0x42   :  { %3614 = vmatprep.subr.bf16.mxu1 %v4082_v2 }
  0x84   :  { %v186_v13 = vpop.permute.xlu0 %185 }
  0x85   :  { %vm190_vm1 = vcmp.eq.s32.totalorder %v186_v13, %v4217_v14  ;;  %v4338_v13 = vsub.s32 1, %v4335_v11 }
  0x88   :  { %v189_v15 = vpop.permute.xlu0 %188 }
  0x89   :  { %vm191_vm2 = vcmp.eq.s32.totalorder %v189_v15, %v4217_v14  ;;  %v114_v15 = vld [vmem:[%s5021_s8] sm:$0x7] }
  0x8a   :  { %vm3112_vm3 = vmpackc.low %vm191_vm2, %vm190_vm1 }
  0x8b   :  { %3585 = vmatmul.mubr.msk.bf16.vlgmr.msra.gmra.mxu0 %vm3112_vm3, %v4084_v16 }
  0x8c   :  { %3604 = vmatprep.mubr.msk.bf16.mxu0 %vm4083_vm0, %v4082_v2  ;;  %3589 = vmatpush3.bf16.msra.mxu0 %v3784_v26 }
  0x8d   :  { %3590 = vmatprep.subr.bf16.mxu0 %v4082_v2 }
  0x90   :  { %3591 = vmatpush3.bf16.msra.mxu0 %v3788_v37 }
  0x91   :  { %3592 = vmatprep.subr.bf16.mxu0 %v4082_v2 }
  0x94   :  { %3593 = vmatpush3.bf16.msra.mxu0 %v3792_v40 }
  0x95   :  { %3594 = vmatprep.subr.bf16.mxu0 %v4082_v2 }
  0x98   :  { %3595 = vmatpush3.bf16.msra.mxu0 %v3796_v43  ;;  %v58_v43 = vld [vmem:[%s5014_s1 + $0x1] sm:$0x1] }
  0x99   :  { %3596 = vmatprep.subr.bf16.mxu0 %v4082_v2  ;;  %v659_v45 = vsub.f32 1.0, %v58_v43 }
  0x9b   :  { %v661_v47 = vmul.f32 -1e+09, %v659_v45 }
  0x9c   :  { %3597 = vmatpush3.bf16.msra.mxu0 %v3800_v46 }
  0x9d   :  { %3598 = vmatprep.subr.bf16.mxu0 %v4082_v2 }
  0xa0   :  { %3599 = vmatpush3.bf16.msra.mxu0 %v3804_v49 }
  0xa1   :  { %3600 = vmatprep.subr.bf16.mxu0 %v4082_v2 }
  0xa4   :  { %3601 = vmatpush3.bf16.msra.mxu0 %v3808_v52 }
  0xa5   :  { %3602 = vmatprep.subr.bf16.mxu0 %v4082_v2 }
  0xa8   :  { %3603 = vmatpush3.bf16.msra.mxu0 %v3812_v55 }
  0xa9   :  { %3608 = vmatprep.subr.bf16.mxu0 %v4082_v2 }
 0x14b   :  { %v277_v18 = vpop.f32.mrf.mxu0 }
 0x14c   :  { %v284_v19 = vadd.f32 %v277_v18, %v75_v17  ;;  %v334_v18 = vrot.slane %v114_v15, %v4338_v13 }
 0x14d   :  { %v3586_v20 = vpop.f32.mrf.mxu0 }
 0x14e   :  { %286 = vadd.xlane.f32.xlu1 %v284_v19 }
 0x14f   :  { %v280_v21 = vpop.f32.mrf.mxu0 }
 0x150   :  { %v285_v22 = vadd.f32 %v280_v21, %v75_v17  ;;  %v337_v17 = vsub.s32 2, %v4335_v11 }
 0x151   :  { %v3587_v23 = vpop.f32.mrf.mxu0 }
 0x152   :  { %288 = vadd.xlane.f32.xlu1 %v285_v22  ;;  %v338_v12 = vrot.slane %v114_v15, %v337_v17 }
 0x1d7   :  { %v287_v27 = vpop.xlane.xlu1 %286 }
 0x1d8   :  { %v291_v28 = vmul.f32 0.0078125, %v287_v27 }
 0x1da   :  { %v4237_v29 = vsub.f32 %v284_v19, %v291_v28  ;;  %v4346_v19 = vsub.s32 0, %v4335_v11 }
 0x1db   :  { %v289_v30 = vpop.xlane.xlu1 %288 }
 0x1dc   :  { %v292_v31 = vmul.f32 0.0078125, %v289_v30  ;;  %v295_v32 = vmul.f32 %v4237_v29, %v4237_v29  ;;  %v330_v25 = vrot.slane %v114_v15, %v4346_v19  ;;  %v667_v46 = vrot.slane %v660_v44, %v4346_v19 }
 0x1dd   :  { %v671_v52 = vrot.slane %v661_v47, %v4346_v19 }
 0x1de   :  { %v4241_v33 = vsub.f32 %v285_v22, %v292_v31  ;;  %297 = vadd.xlane.f32.xlu0 %v295_v32 }
 0x1e0   :  { %v296_v34 = vmul.f32 %v4241_v33, %v4241_v33 }
 0x1e2   :  { %299 = vadd.xlane.f32.xlu1 %v296_v34 }
 0x267   :  { %v298_v56 = vpop.xlane.xlu0 %297 }
 0x268   :  { %v301_v57 = vmul.f32 0.0078125, %v298_v56 }
 0x26a   :  { %v303_v58 = vadd.f32 1e-12, %v301_v57 }
 0x26b   :  { %v300_v59 = vpop.xlane.xlu1 %299 }
 0x26c   :  { %3949 = vrsqrt.f32 %v303_v58  ;;  %v302_v60 = vmul.f32 0.0078125, %v300_v59 }
 0x26e   :  { %v304_v61 = vadd.f32 1e-12, %v302_v60 }
 0x270   :  { %3951 = vrsqrt.f32 %v304_v61 }
 0x279   :  { %v3950_v62 = vpop.eup %3949 }
 0x27a   :  { %v307_v63 = vmul.f32 %v3950_v62, %v4237_v29 }
 0x27c   :  { %v315_v5 = vmul.f32 %v3114_v0, %v307_v63 }
 0x27d   :  { %v3952_v3 = vpop.eup %3951 }
 0x27e   :  { %v308_v4 = vmul.f32 %v3952_v3, %v4241_v33  ;;  %v4324_v8 = vadd.f32 %v3115_v6, %v315_v5 }
 0x280   :  { %v316_v7 = vmul.f32 %v3114_v0, %v308_v4 }
 0x282   :  { %v4326_v9 = vadd.f32 %v3115_v6, %v316_v7 }
 0x284   :  { %v325_v10 = vpack.c.bf16 %v4326_v9, %v4324_v8 }
 0x286   :  { %503 = vmatmul.mubr.bf16.vlgmr.msra.gmra.mxu1 %v325_v10  ;;  %3605 = vmatmul.mubr.bf16.vlgmr.msra.gmra.mxu0 %v325_v10 }
 0x287   :  { %3610 = vmatprep.mubr.msk.bf16.mxu0 %vm4083_vm0, %v4082_v2  ;;  %3616 = vmatprep.mubr.msk.bf16.mxu1 %vm4083_vm0, %v4082_v2 }
 0x346   :  { %v504_v20 = vpop.f32.mrf.mxu1  ;;  %v547_v21 = vpop.f32.mrf.mxu0 }
 0x347   :  { %v505_v33 = vadd.f32 %v504_v20, %v330_v25  ;;  %v548_v35 = vadd.f32 %v547_v21, %v338_v12  ;;  %v3813_v20 = vld [vmem:[%s5022_s9 + $0x38] sm:$0xff]   ;;  %v3814_v21 = vld [vmem:[%s5022_s9 + $0x30] sm:$0xff]  }
 0x348   :  { %v506_v22 = vpop.f32.mrf.mxu1  ;;  %v3606_v23 = vpop.f32.mrf.mxu0 }
 0x349   :  { %v507_v24 = vadd.f32 %v506_v22, %v334_v18  ;;  %v3417_v36 = vpack.c.bf16 %v505_v33, %v505_v33  ;;  %v3421_v38 = vpack.c.bf16 %v548_v35, %v548_v35  ;;  %v3815_v22 = vld [vmem:[%s5022_s9 + $0x28] sm:$0xff]   ;;  %v3816_v23 = vld [vmem:[%s5022_s9 + $0x20] sm:$0xff]  }
 0x34a   :  { %v508_v26 = vpop.f32.mrf.mxu1  ;;  %v550_v27 = vpop.f32.mrf.mxu0  ;;  %v3819_v35 = vld [vmem:[%s5022_s9 + $0x8] sm:$0xff]  }
 0x34b   :  { %v3419_v28 = vpack.c.bf16 %v507_v24, %v507_v24  ;;  %v4351_v29 = vadd.f32 %v550_v27, %v338_v12  ;;  %v509_v37 = vadd.f32 %v508_v26, %v330_v25  ;;  %v706_v40 = vsel %vm704_vm4, %v3421_v38, 0  ;;  %v3817_v12 = vld [vmem:[%s5022_s9 + $0x18] sm:$0xff]  }
 0x34c   :  { %v510_v30 = vpop.f32.mrf.mxu1  ;;  %v3607_v31 = vpop.f32.mrf.mxu0 }
 0x34d   :  { %v511_v32 = vadd.f32 %v510_v30, %v334_v18  ;;  %3609 = vmatpush3.bf16.xpose.msra.mxu0 %v3419_v28  ;;  %v3418_v39 = vpack.c.bf16 %v509_v37, %v509_v37  ;;  %v3422_v27 = vpack.c.bf16 %v4351_v29, %v4351_v29  ;;  %v3818_v29 = vld [vmem:[%s5022_s9 + $0x10] sm:$0xff]  }
 0x34e   :  { %3632 = vmatprep.subr.bf16.mxu0 %v4082_v2 }
 0x34f   :  { %v3420_v34 = vpack.c.bf16 %v511_v32, %v511_v32  ;;  %v752_v32 = vsel %vm704_vm4, %v3422_v27, 0  ;;  %v3845_v27 = vld [vmem:[%s5017_s4 + $0x78] sm:$0xff]  }
 0x351   :  { %3615 = vmatpush3.bf16.xpose.msra.mxu1 %v3420_v34 }
 0x352   :  { %3620 = vmatprep.subr.bf16.mxu1 %v4082_v2 }
 0x354   :  { %3611 = vmatmul.mubr.bf16.vlgmr.msra.gmra.mxu0 %v3417_v36  ;;  %v3820_v36 = vld [vmem:[%s5022_s9] sm:$0xff]  }
 0x355   :  { %3648 = vmatprep.mubr.msk.bf16.mxu0 %vm4083_vm0, %v4082_v2  ;;  %3633 = vmatpush3.bf16.msra.mxu0 %v3813_v20  ;;  %v1287_v20 = vld [vmem:[%s5015_s2 + $0x8] sm:$0xff] }
 0x356   :  { %3634 = vmatprep.subr.bf16.mxu0 %v4082_v2 }
 0x358   :  { %3617 = vmatmul.mubr.bf16.vlgmr.msra.gmra.mxu1 %v3418_v39 }
 0x359   :  { %3621 = vmatpush3.bf16.msra.mxu1 %v706_v40  ;;  %3622 = vmatprep.mubr.msk.bf16.mxu1 %vm4083_vm0, %v4082_v2 }
 0x35a   :  { %3626 = vmatprep.subr.bf16.mxu1 %v4082_v2  ;;  %3635 = vmatpush3.bf16.msra.mxu0 %v3814_v21  ;;  %v3833_v21 = vld [vmem:[%s5024_s11 + $0x30] ss:$8 sps:$4 sm:$0xff]  }
 0x35b   :  { %3636 = vmatprep.subr.bf16.mxu0 %v4082_v2 }
 0x35e   :  { %3637 = vmatpush3.bf16.msra.mxu0 %v3815_v22  ;;  %v3838_v22 = vld [vmem:[%s5024_s11 + $0x24] ss:$8 sps:$4 sm:$0xff]  }
 0x35f   :  { %3638 = vmatprep.subr.bf16.mxu0 %v4082_v2 }
 0x362   :  { %3639 = vmatpush3.bf16.msra.mxu0 %v3816_v23  ;;  %v3836_v23 = vld [vmem:[%s5024_s11 + $0x20] ss:$8 sps:$4 sm:$0xff]  }
 0x363   :  { %3640 = vmatprep.subr.bf16.mxu0 %v4082_v2 }
 0x366   :  { %3641 = vmatpush3.bf16.msra.mxu0 %v3817_v12  ;;  %v3841_v12 = vld [vmem:[%s5024_s11 + $0x14] ss:$8 sps:$4 sm:$0xff]  }
 0x367   :  { %3642 = vmatprep.subr.bf16.mxu0 %v4082_v2 }
 0x36a   :  { %3643 = vmatpush3.bf16.msra.mxu0 %v3818_v29 }
 0x36b   :  { %3644 = vmatprep.subr.bf16.mxu0 %v4082_v2 }
 0x36e   :  { %3645 = vmatpush3.bf16.msra.mxu0 %v3819_v35 }
 0x36f   :  { %3646 = vmatprep.subr.bf16.mxu0 %v4082_v2 }
 0x372   :  { %3647 = vmatpush3.bf16.msra.mxu0 %v3820_v36  ;;  %v3157_v36 = vld [vmem:[%s5019_s6 + $0x2] ss:$0 sm:$0xff] }
 0x414   :  { %v610_v48 = vpop.f32.mrf.mxu0 }
 0x415   :  { %v656_v49 = vmul.f32 0.088388346, %v610_v48 }
 0x416   :  { %v3612_v50 = vpop.f32.mrf.mxu0 }
 0x417   :  { %v674_v51 = vadd.f32 %v667_v46, %v656_v49  ;;  %v3148_v46 = vld [vmem:[%s5023_s10] ss:$0 sm:$0xff] }
 0x418   :  { %v613_v53 = vpop.f32.mrf.mxu0  ;;  %v650_v54 = vpop.f32.mrf.mxu1 }
 0x419   :  { %v657_v55 = vmul.f32 0.088388346, %v650_v54  ;;  %v677_v56 = vsel %vm676_vm5, %v674_v51, -inf }
 0x41a   :  { %v3618_v57 = vpop.f32.mrf.mxu1  ;;  %678 = vmax.xlane.f32.xlu1 %v677_v56  ;;  %v3613_v58 = vpop.f32.mrf.mxu0  ;;  %v3823_v56 = vld [vmem:[%s5024_s11 + $0x74] ss:$8 sps:$4 sm:$0xff]  }
 0x41b   :  { %v675_v59 = vadd.f32 %v671_v52, %v657_v55  ;;  %v3821_v55 = vld [vmem:[%s5024_s11 + $0x70] ss:$8 sps:$4 sm:$0xff]  }
 0x41c   :  { %v653_v60 = vpop.f32.mrf.mxu1 }
 0x41d   :  { %v680_v61 = vsel %vm676_vm5, %v675_v59, -inf }
 0x41e   :  { %v3619_v62 = vpop.f32.mrf.mxu1  ;;  %681 = vmax.xlane.f32.xlu1 %v680_v61 }
 0x4a3   :  { %v679_v63 = vpop.xlane.xlu1 %678 }
 0x4a4   :  { %v683_v0 = vsub.f32 %v674_v51, %v679_v63  ;;  %v3826_v63 = vld [vmem:[%s5024_s11 + $0x64] ss:$8 sps:$4 sm:$0xff]  }
 0x4a6   :  { %v685_v3 = vmul.f32 1.442695, %v683_v0  ;;  %v3824_v0 = vld [vmem:[%s5024_s11 + $0x60] ss:$8 sps:$4 sm:$0xff]  }
 0x4a7   :  { %v682_v4 = vpop.xlane.xlu1 %681 }
 0x4a8   :  { %3953 = vpow2.f32 %v685_v3  ;;  %v684_v5 = vsub.f32 %v675_v59, %v682_v4  ;;  %v1286_v3 = vld [vmem:[%s5015_s2] sm:$0xff]  ;;  %v3829_v4 = vld [vmem:[%s5024_s11 + $0x54] ss:$8 sps:$4 sm:$0xff]  }
 0x4aa   :  { %v687_v6 = vmul.f32 1.442695, %v684_v5  ;;  %v3827_v5 = vld [vmem:[%s5024_s11 + $0x50] ss:$8 sps:$4 sm:$0xff]  }
 0x4ac   :  { %3955 = vpow2.f32 %v687_v6  ;;  %v1288_v6 = vld [vmem:[%s5015_s2 + $0x10] sm:$0xff] }
 0x4b5   :  { %v3954_v7 = vpop.eup %3953 }
 0x4b6   :  { %v689_v10 = vsel %vm676_vm5, %v3954_v7, 0.0 }
 0x4b7   :  { %690 = vadd.xlane.f32.xlu1 %v689_v10  ;;  %v3832_v10 = vld [vmem:[%s5024_s11 + $0x44] ss:$8 sps:$4 sm:$0xff]  }
 0x4b9   :  { %v3956_v15 = vpop.eup %3955 }
 0x4ba   :  { %v692_v18 = vsel %vm676_vm5, %v3956_v15, 0.0 }
 0x4bb   :  { %693 = vadd.xlane.f32.xlu1 %v692_v18  ;;  %v3835_v18 = vld [vmem:[%s5024_s11 + $0x34] ss:$8 sps:$4 sm:$0xff]  }
 0x540   :  { %v691_v24 = vpop.xlane.xlu1 %690 }
 0x541   :  { %3957 = vrcp.f32 %v691_v24  ;;  %v3839_v24 = vld [vmem:[%s5024_s11 + $0x10] ss:$8 sps:$4 sm:$0xff]  }
 0x544   :  { %v694_v25 = vpop.xlane.xlu1 %693 }
 0x545   :  { %3959 = vrcp.f32 %v694_v25  ;;  %v3844_v25 = vld [vmem:[%s5024_s11 + $0x4] ss:$8 sps:$4 sm:$0xff]  }
 0x54e   :  { %v3958_v26 = vpop.eup %3957 }
 0x54f   :  { %v696_v28 = vmul.f32 %v3958_v26, %v3954_v7  ;;  %v3830_v7 = vld [vmem:[%s5024_s11 + $0x40] ss:$8 sps:$4 sm:$0xff]  }
 0x550   :  { %v3842_v26 = vld [vmem:[%s5024_s11] ss:$8 sps:$4 sm:$0xff]  }
 0x551   :  { %v699_v30 = vpack.c.bf16 %v696_v28, %v696_v28 }
 0x552   :  { %v3960_v31 = vpop.eup %3959 }
 0x553   :  { %3623 = vmatmul.mubr.msk.bf16.vlgmr.msra.gmra.mxu1 %vm676_vm5, %v699_v30  ;;  %v698_v33 = vmul.f32 %v3960_v31, %v3956_v15  ;;  %v1289_v15 = vld [vmem:[%s5015_s2 + $0x18] sm:$0xff] }
 0x554   :  { %3627 = vmatpush3.bf16.msra.mxu1 %v752_v32  ;;  %3628 = vmatprep.mubr.msk.bf16.mxu1 %vm4083_vm0, %v4082_v2 }
 0x555   :  { %v700_v34 = vpack.c.bf16 %v698_v33, %v698_v33  ;;  %1022 = vmatprep.subr.bf16.mxu1 %v3823_v56  ;;  %v3853_v56 = vld [vmem:[%s5026_s13 + $0x78] sm:$0xff]  }
 0x556   :  { %3470 = vmatprep.subr.bf16.mxu0 %v3853_v56 }
 0x55b   :  { %3629 = vmatmul.mubr.msk.bf16.vlgmr.msra.gmra.mxu1 %vm676_vm5, %v700_v34 }
 0x55c   :  { %1054 = vmatprep.mubr.bf16.mxu1 %v4081_v1  ;;  %1023 = vmatpush1.bf16.msra.mxu1 %v3821_v55 }
 0x55d   :  { %1024 = vmatprep.subr.bf16.mxu1 %v3826_v63  ;;  %v3863_v63 = vld [vmem:[%s5026_s13 + $0x50] sm:$0xff]  }
 0x560   :  { %1025 = vmatpush1.bf16.msra.mxu1 %v3824_v0  ;;  %v3864_v0 = vld [vmem:[%s5026_s13 + $0x10] sm:$0xff]  }
 0x561   :  { %1026 = vmatprep.subr.bf16.mxu1 %v3829_v4  ;;  %v3866_v4 = vld [vmem:[%s5026_s13 + $0x8] sm:$0xff]  }
 0x564   :  { %1027 = vmatpush1.bf16.msra.mxu1 %v3827_v5  ;;  %v3867_v5 = vld [vmem:[%s5026_s13 + $0x40] sm:$0xff]  }
 0x565   :  { %1028 = vmatprep.subr.bf16.mxu1 %v3832_v10 }
 0x568   :  { %1029 = vmatpush1.bf16.msra.mxu1 %v3830_v7  ;;  %v148_v7 = vld [vmem:[%s5025_s12] sm:$0x3] }
 0x569   :  { %1030 = vmatprep.subr.bf16.mxu1 %v3835_v18  ;;  %v935_v10 = vrot.slane %v148_v7, %v4346_v19 }
 0x56c   :  { %1031 = vmatpush1.bf16.msra.mxu1 %v3833_v21 }
 0x56d   :  { %1032 = vmatprep.subr.bf16.mxu1 %v3838_v22 }
 0x570   :  { %1033 = vmatpush1.bf16.msra.mxu1 %v3836_v23 }
 0x571   :  { %1034 = vmatprep.subr.bf16.mxu1 %v3841_v12 }
 0x574   :  { %1035 = vmatpush1.bf16.msra.mxu1 %v3839_v24 }
 0x575   :  { %1036 = vmatprep.subr.bf16.mxu1 %v3844_v25 }
 0x578   :  { %1037 = vmatpush1.bf16.msra.mxu1 %v3842_v26 }
 0x579   :  { %3652 = vmatprep.subr.bf16.mxu1 %v3845_v27 }
 0x613   :  { %v742_v37 = vpop.f32.mrf.mxu1 }
 0x615   :  { %v3624_v38 = vpop.f32.mrf.mxu1 }
 0x617   :  { %v745_v39 = vpop.f32.mrf.mxu1 }
 0x619   :  { %v3625_v40 = vpop.f32.mrf.mxu1 }
 0x61a   :  { %v3158_v40 = vld [vmem:[%s5019_s6 + $0x3] ss:$0 sm:$0xff] }
 0x61b   :  { %v788_v41 = vpop.f32.mrf.mxu1 }
 0x61c   :  { %v794_v42 = vpack.c.bf16 %v788_v41, %v742_v37 }
 0x61d   :  { %v3630_v43 = vpop.f32.mrf.mxu1 }
 0x61e   :  { %3649 = vmatmul.mubr.bf16.vlgmr.msra.gmra.mxu0 %v794_v42 }
 0x61f   :  { %v791_v44 = vpop.f32.mrf.mxu1 }
 0x621   :  { %v3631_v45 = vpop.f32.mrf.mxu1 }
 0x6de   :  { %v883_v47 = vpop.f32.mrf.mxu0 }
 0x6df   :  { %v884_v48 = vadd.f32 %v3148_v46, %v883_v47  ;;  %v3846_v47 = vld [vmem:[%s5017_s4 + $0x70] sm:$0xff]  }
 0x6e0   :  { %v3650_v49 = vpop.f32.mrf.mxu0 }
 0x6e1   :  { %v890_v50 = vadd.f32 %v884_v48, %v4324_v8  ;;  %v3847_v48 = vld [vmem:[%s5017_s4 + $0x68] sm:$0xff]   ;;  %v3848_v49 = vld [vmem:[%s5017_s4 + $0x60] sm:$0xff]  }
 0x6e2   :  { %v886_v51 = vpop.f32.mrf.mxu0 }
 0x6e3   :  { %v887_v52 = vadd.f32 %v3148_v46, %v886_v51  ;;  %892 = vadd.xlane.f32.xlu1 %v890_v50  ;;  %v3850_v51 = vld [vmem:[%s5017_s4 + $0x50] sm:$0xff]  }
 0x6e4   :  { %v3651_v53 = vpop.f32.mrf.mxu0 }
 0x6e5   :  { %v891_v54 = vadd.f32 %v887_v52, %v4326_v9  ;;  %v3851_v52 = vld [vmem:[%s5017_s4 + $0x48] sm:$0xff]  }
 0x6e7   :  { %894 = vadd.xlane.f32.xlu1 %v891_v54 }
 0x76c   :  { %v893_v57 = vpop.xlane.xlu1 %892 }
 0x76d   :  { %v896_v58 = vmul.f32 0.0078125, %v893_v57  ;;  %v3854_v57 = vld [vmem:[%s5026_s13 + $0x38] sm:$0xff]  }
 0x76e   :  { %3471 = vmatpush3.bf16.msra.mxu0 %v3854_v57 }
 0x76f   :  { %v898_v8 = vsub.f32 %v890_v50, %v896_v58  ;;  %v3849_v50 = vld [vmem:[%s5017_s4 + $0x58] sm:$0xff]   ;;  %v3855_v58 = vld [vmem:[%s5026_s13 + $0x70] sm:$0xff]  }
 0x770   :  { %v895_v59 = vpop.xlane.xlu1 %894  ;;  %3472 = vmatprep.subr.bf16.mxu0 %v3855_v58 }
 0x771   :  { %v897_v60 = vmul.f32 0.0078125, %v895_v59  ;;  %v900_v61 = vmul.f32 %v898_v8, %v898_v8  ;;  %v3858_v59 = vld [vmem:[%s5026_s13 + $0x28] sm:$0xff]  }
 0x773   :  { %v899_v62 = vsub.f32 %v891_v54, %v897_v60  ;;  %902 = vadd.xlane.f32.xlu1 %v900_v61  ;;  %v3852_v54 = vld [vmem:[%s5017_s4 + $0x40] sm:$0xff]  }
 0x774   :  { %v3859_v60 = vld [vmem:[%s5026_s13 + $0x60] sm:$0xff]  }
 0x775   :  { %v901_v9 = vmul.f32 %v899_v62, %v899_v62  ;;  %v3860_v61 = vld [vmem:[%s5026_s13 + $0x20] sm:$0xff]  }
 0x777   :  { %904 = vadd.xlane.f32.xlu0 %v901_v9  ;;  %v3862_v9 = vld [vmem:[%s5026_s13 + $0x18] sm:$0xff]  }
 0x784   :  { %1429 = vperm.xlu1 %3772, %v1286_v3   ;;  %v3865_v3 = vld [vmem:[%s5026_s13 + $0x48] sm:$0xff]  }
 0x788   :  { %1435 = vperm.xlu1 %3772, %v1288_v6   ;;  %v3868_v6 = vld [vmem:[%s5026_s13] sm:$0xff]  }
 0x78c   :  { %1438 = vperm.xlu1 %3772, %v1289_v15   ;;  %v939_v15 = vrot.slane %v148_v7, %v4338_v13 }
 0x78d   :  { %1432 = vperm.xlu0 %3771, %v1287_v20  }
 0x7fc   :  { %v903_v28 = vpop.xlane.xlu1 %902 }
 0x7fd   :  { %v906_v30 = vmul.f32 0.0078125, %v903_v28 }
 0x7ff   :  { %v908_v31 = vadd.f32 1e-12, %v906_v30 }
 0x800   :  { %v905_v32 = vpop.xlane.xlu0 %904  ;;  %v1430_v42 = vpop.permute.xlu1 %1429 }
 0x801   :  { %3961 = vrsqrt.f32 %v908_v31  ;;  %v907_v33 = vmul.f32 0.0078125, %v905_v32  ;;  %vm1440_vm7 = vcmp.eq.s32.totalorder %v1430_v42, %v4217_v14 }
 0x803   :  { %v909_v34 = vadd.f32 1e-12, %v907_v33 }
 0x804   :  { %v1436_v53 = vpop.permute.xlu1 %1435 }
 0x805   :  { %3963 = vrsqrt.f32 %v909_v34  ;;  %vm1442_vm9 = vcmp.eq.s32.totalorder %v1436_v53, %v4217_v14 }
 0x808   :  { %v1433_v41 = vpop.permute.xlu0 %1432  ;;  %v1439_v55 = vpop.permute.xlu1 %1438 }
 0x809   :  { %vm1441_vm6 = vcmp.eq.s32.totalorder %v1433_v41, %v4217_v14  ;;  %vm1443_vm10 = vcmp.eq.s32.totalorder %v1439_v55, %v4217_v14 }
 0x80a   :  { %vm3325_vm8 = vmpackc.low %vm1441_vm6, %vm1440_vm7 }
 0x80b   :  { %vm3327_vm11 = vmpackc.low %vm1443_vm10, %vm1442_vm9 }
 0x80e   :  { %v3962_v29 = vpop.eup %3961 }
 0x80f   :  { %v912_v35 = vmul.f32 %v3962_v29, %v898_v8  ;;  %v3856_v8 = vld [vmem:[%s5026_s13 + $0x30] sm:$0xff]  }
 0x810   :  { %3473 = vmatpush3.bf16.msra.mxu0 %v3856_v8  ;;  %v3210_v8 = vld [vmem:[%s5018_s5 + $0x8] sm:$0xff] }
 0x811   :  { %v920_v39 = vmul.f32 %v3157_v36, %v912_v35 }
 0x812   :  { %v3964_v37 = vpop.eup %3963 }
 0x813   :  { %v913_v38 = vmul.f32 %v3964_v37, %v899_v62  ;;  %v4486_v44 = vadd.f32 %v3158_v40, %v920_v39  ;;  %v3861_v62 = vld [vmem:[%s5026_s13 + $0x58] sm:$0xff]  }
 0x815   :  { %v921_v43 = vmul.f32 %v3157_v36, %v913_v38 }
 0x817   :  { %v4488_v45 = vadd.f32 %v3158_v40, %v921_v43 }
 0x819   :  { %v930_v46 = vpack.c.bf16 %v4488_v45, %v4486_v44 }
 0x81b   :  { %1055 = vmatmul.mubr.bf16.vlgmr.msra.gmra.mxu1 %v930_v46 }
 0x81c   :  { %3653 = vmatpush3.bf16.msra.mxu1 %v3845_v27  ;;  %3668 = vmatprep.mubr.msk.bf16.mxu1 %vm3325_vm8, %v4084_v16 }
 0x81d   :  { %3654 = vmatprep.subr.bf16.mxu1 %v3846_v47 }
 0x820   :  { %3655 = vmatpush3.bf16.msra.mxu1 %v3846_v47 }
 0x821   :  { %3656 = vmatprep.subr.bf16.mxu1 %v3847_v48 }
 0x824   :  { %3657 = vmatpush3.bf16.msra.mxu1 %v3847_v48 }
 0x825   :  { %3658 = vmatprep.subr.bf16.mxu1 %v3848_v49 }
 0x828   :  { %3659 = vmatpush3.bf16.msra.mxu1 %v3848_v49 }
 0x829   :  { %3660 = vmatprep.subr.bf16.mxu1 %v3849_v50 }
 0x82c   :  { %3661 = vmatpush3.bf16.msra.mxu1 %v3849_v50 }
 0x82d   :  { %3662 = vmatprep.subr.bf16.mxu1 %v3850_v51 }
 0x830   :  { %3663 = vmatpush3.bf16.msra.mxu1 %v3850_v51 }
 0x831   :  { %3664 = vmatprep.subr.bf16.mxu1 %v3851_v52 }
 0x834   :  { %3665 = vmatpush3.bf16.msra.mxu1 %v3851_v52 }
 0x835   :  { %3666 = vmatprep.subr.bf16.mxu1 %v3852_v54 }
 0x838   :  { %3667 = vmatpush3.bf16.msra.mxu1 %v3852_v54 }
 0x83b   :  { %3669 = vmatmul.mubr.msk.bf16.vlgmr.msra.gmra.mxu1 %vm3327_vm11, %v4084_v16  ;;  %v3857_v16 = vld [vmem:[%s5026_s13 + $0x68] sm:$0xff]  }
 0x83c   :  { %3474 = vmatprep.subr.bf16.mxu0 %v3857_v16 }
 0x83d   :  { %3475 = vmatpush3.bf16.msra.mxu0 %v3858_v59 }
 0x83e   :  { %3476 = vmatprep.subr.bf16.mxu0 %v3859_v60 }
 0x841   :  { %3477 = vmatpush3.bf16.msra.mxu0 %v3860_v61 }
 0x842   :  { %3478 = vmatprep.subr.bf16.mxu0 %v3861_v62 }
 0x845   :  { %3479 = vmatpush3.bf16.msra.mxu0 %v3862_v9 }
 0x846   :  { %3480 = vmatprep.subr.bf16.mxu0 %v3863_v63 }
 0x849   :  { %3481 = vmatpush3.bf16.msra.mxu0 %v3864_v0 }
 0x84a   :  { %3482 = vmatprep.subr.bf16.mxu0 %v3865_v3 }
 0x84d   :  { %3483 = vmatpush3.bf16.msra.mxu0 %v3866_v4 }
 0x84e   :  { %3484 = vmatprep.subr.bf16.mxu0 %v3867_v5 }
 0x851   :  { %3485 = vmatpush3.bf16.msra.mxu0 %v3868_v6 }
 0x8db   :  { %v1056_v18 = vpop.f32.mrf.mxu1 }
 0x8dc   :  { %v1057_v20 = vadd.f32 %v1056_v18, %v935_v10  ;;  %v3869_v18 = vld [vmem:[%s5020_s7 + $0x168] ss:$12 sps:$4 sm:$0xff]  }
 0x8dd   :  { %v1058_v21 = vpop.f32.mrf.mxu1 }
 0x8de   :  { %v1065_v22 = vmul.f32 %v1057_v20, %v1057_v20  ;;  %v1059_v23 = vadd.f32 %v1058_v21, %v939_v15 }
 0x8df   :  { %v1060_v12 = vpop.f32.mrf.mxu1 }
 0x8e0   :  { %v1069_v24 = vmul.f32 %v1065_v22, %v1057_v20  ;;  %v1066_v25 = vmul.f32 %v1059_v23, %v1059_v23  ;;  %v1061_v26 = vadd.f32 %v1060_v12, %v935_v10 }
 0x8e1   :  { %v1062_v27 = vpop.f32.mrf.mxu1 }
 0x8e2   :  { %v1073_v28 = vmul.f32 0.044715, %v1069_v24  ;;  %v1070_v30 = vmul.f32 %v1066_v25, %v1059_v23  ;;  %v1067_v31 = vmul.f32 %v1061_v26, %v1061_v26  ;;  %v1063_v32 = vadd.f32 %v1062_v27, %v939_v15 }
 0x8e4   :  { %v1077_v33 = vadd.f32 %v1073_v28, %v1057_v20  ;;  %v1074_v34 = vmul.f32 0.044715, %v1070_v30  ;;  %v1071_v29 = vmul.f32 %v1067_v31, %v1061_v26  ;;  %v1068_v35 = vmul.f32 %v1063_v32, %v1063_v32 }
 0x8e6   :  { %v1081_v36 = vmul.f32 0.7978846, %v1077_v33  ;;  %v1078_v37 = vadd.f32 %v1074_v34, %v1059_v23  ;;  %v1075_v38 = vmul.f32 0.044715, %v1071_v29  ;;  %v1072_v39 = vmul.f32 %v1068_v35, %v1063_v32 }
 0x8e8   :  { %v1082_v40 = vmul.f32 0.7978846, %v1078_v37  ;;  %v1079_v41 = vadd.f32 %v1075_v38, %v1061_v26  ;;  %v1076_v42 = vmul.f32 0.044715, %v1072_v39  ;;  %3965 = vtanh.f32 %v1081_v36  ;;  %v3874_v36 = vld [vmem:[%s5020_s7 + $0x154] ss:$12 sps:$4 sm:$0xff]  }
 0x8e9   :  { %v3875_v37 = vld [vmem:[%s5020_s7 + $0x170] ss:$12 sps:$4 sm:$0xff]  }
 0x8ea   :  { %3967 = vtanh.f32 %v1082_v40  ;;  %v1083_v43 = vmul.f32 0.7978846, %v1079_v41  ;;  %v1080_v46 = vadd.f32 %v1076_v42, %v1063_v32  ;;  %v3872_v38 = vld [vmem:[%s5020_s7 + $0x150] ss:$12 sps:$4 sm:$0xff]   ;;  %3672 = vmatprep.subr.bf16.mxu1 %v3875_v37  ;;  %v3879_v40 = vld [vmem:[%s5020_s7 + $0x158] ss:$12 sps:$4 sm:$0xff]  }
 0x8eb   :  { %3673 = vmatpush3.bf16.msra.mxu1 %v3875_v37  ;;  %v3878_v39 = vld [vmem:[%s5020_s7 + $0x13c] ss:$12 sps:$4 sm:$0xff]   ;;  %v3876_v41 = vld [vmem:[%s5020_s7 + $0x138] ss:$12 sps:$4 sm:$0xff]  }
 0x8ec   :  { %3969 = vtanh.f32 %v1083_v43  ;;  %v1084_v47 = vmul.f32 0.7978846, %v1080_v46  ;;  %3674 = vmatprep.subr.bf16.mxu1 %v3879_v40  ;;  %v3882_v42 = vld [vmem:[%s5020_s7 + $0x124] ss:$12 sps:$4 sm:$0xff]   ;;  %v3883_v43 = vld [vmem:[%s5020_s7 + $0x140] ss:$12 sps:$4 sm:$0xff]  }
 0x8ed   :  { %v3880_v46 = vld [vmem:[%s5020_s7 + $0x120] ss:$12 sps:$4 sm:$0xff]  }
 0x8ee   :  { %3971 = vtanh.f32 %v1084_v47  ;;  %v3884_v47 = vld [vmem:[%s5020_s7 + $0x108] ss:$12 sps:$4 sm:$0xff]  }
 0x8ef   :  { %3675 = vmatpush3.bf16.msra.mxu1 %v3879_v40 }
 0x8f0   :  { %3676 = vmatprep.subr.bf16.mxu1 %v3883_v43 }
 0x8f3   :  { %3677 = vmatpush3.bf16.msra.mxu1 %v3883_v43 }
 0x8f5   :  { %v3966_v48 = vpop.eup %3965 }
 0x8f6   :  { %v1089_v52 = vadd.f32 1.0, %v3966_v48  ;;  %v3886_v48 = vld [vmem:[%s5020_s7 + $0x10c] ss:$12 sps:$4 sm:$0xff]  }
 0x8f7   :  { %v3968_v49 = vpop.eup %3967 }
 0x8f8   :  { %v1090_v50 = vadd.f32 1.0, %v3968_v49  ;;  %v1093_v59 = vmul.f32 0.5, %v1089_v52  ;;  %v3887_v49 = vld [vmem:[%s5020_s7 + $0x128] ss:$12 sps:$4 sm:$0xff]   ;;  %v3888_v52 = vld [vmem:[%s5020_s7 + $0xf0] ss:$12 sps:$4 sm:$0xff]  }
 0x8f9   :  { %v3970_v51 = vpop.eup %3969  ;;  %3678 = vmatprep.subr.bf16.mxu1 %v3887_v49 }
 0x8fa   :  { %v1091_v53 = vadd.f32 1.0, %v3970_v51  ;;  %v1094_v58 = vmul.f32 0.5, %v1090_v50  ;;  %v1097_v4 = vmul.f32 %v1093_v59, %v1057_v20  ;;  %v3871_v20 = vld [vmem:[%s5020_s7 + $0x16c] ss:$12 sps:$4 sm:$0xff]   ;;  %v3890_v50 = vld [vmem:[%s5020_s7 + $0xf4] ss:$12 sps:$4 sm:$0xff]   ;;  %3679 = vmatpush3.bf16.msra.mxu1 %v3887_v49 }
 0x8fb   :  { %v3972_v54 = vpop.eup %3971  ;;  %v3670_v55 = vpop.f32.mrf.mxu1  ;;  %1761 = vmatprep.subr.bf16.mxu0 %v3871_v20  ;;  %v3891_v51 = vld [vmem:[%s5020_s7 + $0x110] ss:$12 sps:$4 sm:$0xff]  }
 0x8fc   :  { %v1095_v56 = vmul.f32 0.5, %v1091_v53  ;;  %v1092_v57 = vadd.f32 1.0, %v3972_v54  ;;  %v1098_v63 = vmul.f32 %v1094_v58, %v1059_v23  ;;  %v1549_v5 = vadd.f32 %v3670_v55, %v3210_v8  ;;  %3680 = vmatprep.subr.bf16.mxu1 %v3891_v51  ;;  %v3894_v53 = vld [vmem:[%s5020_s7 + $0xdc] ss:$12 sps:$4 sm:$0xff]   ;;  %v3895_v54 = vld [vmem:[%s5020_s7 + $0xf8] ss:$12 sps:$4 sm:$0xff]  }
 0x8fd   :  { %v1532_v16 = vpop.f32.mrf.mxu1  ;;  %v3892_v55 = vld [vmem:[%s5020_s7 + $0xd8] ss:$12 sps:$4 sm:$0xff]   ;;  %v3896_v58 = vld [vmem:[%s5020_s7 + $0xc0] ss:$12 sps:$4 sm:$0xff]  }
 0x8fe   :  { %v1547_v60 = vadd.f32 %v3210_v8, %v1532_v16  ;;  %v1096_v61 = vmul.f32 0.5, %v1092_v57  ;;  %v1099_v9 = vmul.f32 %v1095_v56, %v1061_v26  ;;  %3681 = vmatpush3.bf16.msra.mxu1 %v3891_v51  ;;  %v3898_v56 = vld [vmem:[%s5020_s7 + $0xc4] ss:$12 sps:$4 sm:$0xff]   ;;  %v3899_v57 = vld [vmem:[%s5020_s7 + $0xe0] ss:$12 sps:$4 sm:$0xff]  }
 0x8ff   :  { %v3671_v62 = vpop.f32.mrf.mxu1  ;;  %3682 = vmatprep.subr.bf16.mxu1 %v3895_v54 }
 0x900   :  { %1551 = vadd.xlane.f32.xlu0 %v1547_v60  ;;  %v1100_v0 = vmul.f32 %v1096_v61, %v1063_v32  ;;  %v1101_v10 = vpack.c.bf16 %v1099_v9, %v1097_v4  ;;  %v1550_v15 = vadd.f32 %v3671_v62, %v3210_v8 }
 0x901   :  { %v1535_v3 = vpop.f32.mrf.mxu1 }
 0x902   :  { %v1548_v6 = vadd.f32 %v3210_v8, %v1535_v3  ;;  %v1102_v7 = vpack.c.bf16 %v1100_v0, %v1098_v63  ;;  %3683 = vmatpush3.bf16.msra.mxu1 %v3895_v54  ;;  %v3900_v8 = vld [vmem:[%s5020_s7 + $0xc8] ss:$12 sps:$4 sm:$0xff]  }
 0x903   :  { %3684 = vmatprep.subr.bf16.mxu1 %v3899_v57 }
 0x904   :  { %1555 = vadd.xlane.f32.xlu0 %v1549_v5  ;;  %1553 = vadd.xlane.f32.xlu1 %v1548_v6 }
 0x905   :  { %1237 = vmatprep.mubr.bf16.mxu0 %v1102_v7 }
 0x906   :  { %1238 = vmatmul.mubr.bf16.vlgmr.msra.gmra.mxu0 %v1101_v10  ;;  %3685 = vmatpush3.bf16.msra.mxu1 %v3899_v57 }
 0x907   :  { %1793 = vmatprep.mubr.bf16.mxu0 %v4081_v1  ;;  %1762 = vmatpush1.bf16.msra.mxu0 %v3869_v18 }
 0x908   :  { %1557 = vadd.xlane.f32.xlu0 %v1550_v15  ;;  %1763 = vmatprep.subr.bf16.mxu0 %v3874_v36 }
 0x909   :  { %3686 = vmatprep.subr.bf16.mxu1 %v3900_v8 }
 0x90a   :  { %3687 = vmatpush3.bf16.msra.mxu1 %v3900_v8 }
 0x90b   :  { %1764 = vmatpush1.bf16.msra.mxu0 %v3872_v38  ;;  %3692 = vmatprep.subr.bf16.mxu1 %v4082_v2 }
 0x90c   :  { %1765 = vmatprep.subr.bf16.mxu0 %v3878_v39  ;;  %v3249_v39 = vld [vmem:[%s5021_s8 + $0x3] sm:$0x7] }
 0x90d   :  { %v1629_v43 = vrot.slane %v3249_v39, %v337_v17 }
 0x90f   :  { %1766 = vmatpush1.bf16.msra.mxu0 %v3876_v41  ;;  %v1625_v41 = vrot.slane %v3249_v39, %v4338_v13 }
 0x910   :  { %1767 = vmatprep.subr.bf16.mxu0 %v3882_v42 }
 0x913   :  { %1768 = vmatpush1.bf16.msra.mxu0 %v3880_v46 }
 0x914   :  { %1769 = vmatprep.subr.bf16.mxu0 %v3886_v48  ;;  %v1621_v48 = vrot.slane %v3249_v39, %v4346_v19 }
 0x917   :  { %1770 = vmatpush1.bf16.msra.mxu0 %v3884_v47 }
 0x918   :  { %1771 = vmatprep.subr.bf16.mxu0 %v3890_v50 }
 0x91b   :  { %1772 = vmatpush1.bf16.msra.mxu0 %v3888_v52 }
 0x91c   :  { %1773 = vmatprep.subr.bf16.mxu0 %v3894_v53 }
 0x91f   :  { %1774 = vmatpush1.bf16.msra.mxu0 %v3892_v55 }
 0x920   :  { %1775 = vmatprep.subr.bf16.mxu0 %v3898_v56 }
 0x923   :  { %1776 = vmatpush1.bf16.msra.mxu0 %v3896_v58 }
 0x924   :  { %3698 = vmatprep.subr.bf16.mxu0 %v4082_v2 }
 0x989   :  { %v1552_v21 = vpop.xlane.xlu0 %1551 }
 0x98a   :  { %v1559_v22 = vmul.f32 0.0078125, %v1552_v21  ;;  %v3329_v21 = vld [vmem:[%s5019_s6 + $0x6] ss:$0 sm:$0xff] }
 0x98c   :  { %v4582_v23 = vsub.f32 %v1547_v60, %v1559_v22 }
 0x98d   :  { %v1556_v12 = vpop.xlane.xlu0 %1555  ;;  %v1554_v24 = vpop.xlane.xlu1 %1553 }
 0x98e   :  { %v1561_v25 = vmul.f32 0.0078125, %v1556_v12  ;;  %v1560_v26 = vmul.f32 0.0078125, %v1554_v24  ;;  %v1567_v27 = vmul.f32 %v4582_v23, %v4582_v23 }
 0x990   :  { %v4586_v28 = vsub.f32 %v1549_v5, %v1561_v25  ;;  %v4588_v30 = vsub.f32 %v1548_v6, %v1560_v26  ;;  %1571 = vadd.xlane.f32.xlu1 %v1567_v27  ;;  %v3330_v26 = vld [vmem:[%s5019_s6 + $0x7] ss:$0 sm:$0xff] }
 0x991   :  { %v1558_v31 = vpop.xlane.xlu0 %1557 }
 0x992   :  { %v1562_v32 = vmul.f32 0.0078125, %v1558_v31  ;;  %v1569_v33 = vmul.f32 %v4586_v28, %v4586_v28  ;;  %v1568_v34 = vmul.f32 %v4588_v30, %v4588_v30 }
 0x994   :  { %v4594_v29 = vsub.f32 %v1550_v15, %v1562_v32  ;;  %1575 = vadd.xlane.f32.xlu1 %v1569_v33  ;;  %1573 = vadd.xlane.f32.xlu0 %v1568_v34 }
 0x996   :  { %v1570_v35 = vmul.f32 %v4594_v29, %v4594_v29 }
 0x998   :  { %1577 = vadd.xlane.f32.xlu0 %v1570_v35 }
 0x9c6   :  { %v3486_v16 = vpop.f32.mrf.mxu0 }
 0x9c8   :  { %v3487_v59 = vpop.f32.mrf.mxu0 }
 0x9c9   :  { %v4666_v60 = vadd.f32 %v3487_v59, %v3486_v16 }
 0xa19   :  { %v1572_v61 = vpop.xlane.xlu1 %1571 }
 0xa1a   :  { %v1579_v62 = vmul.f32 0.0078125, %v1572_v61 }
 0xa1c   :  { %v1583_v9 = vadd.f32 1e-12, %v1579_v62 }
 0xa1d   :  { %v1574_v63 = vpop.xlane.xlu0 %1573  ;;  %v1576_v0 = vpop.xlane.xlu1 %1575 }
 0xa1e   :  { %3973 = vrsqrt.f32 %v1583_v9  ;;  %v1580_v3 = vmul.f32 0.0078125, %v1574_v63  ;;  %v1581_v4 = vmul.f32 0.0078125, %v1576_v0 }
 0xa20   :  { %v1584_v5 = vadd.f32 1e-12, %v1580_v3  ;;  %v1585_v6 = vadd.f32 1e-12, %v1581_v4 }
 0xa21   :  { %v1578_v7 = vpop.xlane.xlu0 %1577 }
 0xa22   :  { %3975 = vrsqrt.f32 %v1584_v5  ;;  %v1582_v10 = vmul.f32 0.0078125, %v1578_v7 }
 0xa23   :  { %3977 = vrsqrt.f32 %v1585_v6 }
 0xa24   :  { %v1586_v15 = vadd.f32 1e-12, %v1582_v10 }
 0xa26   :  { %3979 = vrsqrt.f32 %v1586_v15 }
 0xa2b   :  { %v3974_v18 = vpop.eup %3973 }
 0xa2c   :  { %v1591_v20 = vmul.f32 %v3974_v18, %v4582_v23 }
 0xa2e   :  { %v1601_v25 = vmul.f32 %v3329_v21, %v1591_v20 }
 0xa2f   :  { %v3976_v22 = vpop.eup %3975 }
 0xa30   :  { %v3978_v12 = vpop.eup %3977  ;;  %v1592_v24 = vmul.f32 %v3976_v22, %v4588_v30  ;;  %v4677_v33 = vadd.f32 %v3330_v26, %v1601_v25 }
 0xa31   :  { %v1593_v27 = vmul.f32 %v3978_v12, %v4586_v28 }
 0xa32   :  { %v1602_v31 = vmul.f32 %v3329_v21, %v1592_v24 }
 0xa33   :  { %v3980_v32 = vpop.eup %3979  ;;  %v1603_v35 = vmul.f32 %v3329_v21, %v1593_v27 }
 0xa34   :  { %v4679_v23 = vadd.f32 %v3330_v26, %v1602_v31  ;;  %v1594_v34 = vmul.f32 %v3980_v32, %v4594_v29  ;;  %v4695_v29 = vpop.f32.mrf.mxu0  ;;  %v1291_v31 = vld [vmem:[%s5016_s3 + $0x1] sm:$0x1] }
 0xa35   :  { %v4684_v37 = vadd.f32 %v3330_v26, %v1603_v35  ;;  %v1292_v35 = vld [vmem:[%s5016_s3 + $0x2] sm:$0x1] }
 0xa36   :  { %v1615_v36 = vpack.c.bf16 %v4679_v23, %v4677_v33  ;;  %v1604_v30 = vmul.f32 %v3329_v21, %v1594_v34  ;;  %v4700_v40 = vpop.f32.mrf.mxu0  ;;  %v2072_v34 = vsub.f32 1.0, %v1291_v31 }
 0xa38   :  { %1794 = vmatmul.mubr.bf16.vlgmr.msra.gmra.mxu0 %v1615_v36  ;;  %3688 = vmatprep.mubr.bf16.mxu1 %v1615_v36  ;;  %v4686_v38 = vadd.f32 %v3330_v26, %v1604_v30  ;;  %v1290_v26 = vld [vmem:[%s5016_s3] sm:$0x1]  ;;  %v2076_v30 = vmul.f32 -1e+09, %v2072_v34 }
 0xa39   :  { %1803 = vmatprep.mubr.bf16.mxu0 %v4081_v1  ;;  %v2071_v27 = vsub.f32 1.0, %v1290_v26 }
 0xa3a   :  { %v1616_v28 = vpack.c.bf16 %v4686_v38, %v4684_v37 }
 0xa3b   :  { %v2075_v32 = vmul.f32 -1e+09, %v2071_v27 }
 0xa3c   :  { %3689 = vmatmul.mubr.bf16.vlgmr.msra.gmra.mxu1 %v1616_v28 }
 0xa3d   :  { %3694 = vmatprep.mubr.msk.bf16.mxu1 %vm4083_vm0, %v4082_v2  ;;  %v2086_v36 = vrot.slane %v2075_v32, %v4346_v19 }
 0xa40   :  { %1804 = vmatmul.mubr.bf16.gmra.mxu0 %v1616_v28  ;;  %v2073_v28 = vsub.f32 1.0, %v1292_v35 }
 0xa41   :  { %3700 = vmatprep.mubr.msk.bf16.mxu0 %vm4083_vm0, %v4082_v2 }
 0xaf8   :  { %v1795_v42 = vpop.f32.mrf.mxu0 }
 0xaf9   :  { %v1796_v56 = vadd.f32 %v1795_v42, %v1621_v48 }
 0xafa   :  { %v1797_v46 = vpop.f32.mrf.mxu0 }
 0xafb   :  { %v1798_v47 = vadd.f32 %v1797_v46, %v1625_v41  ;;  %v3423_v61 = vpack.c.bf16 %v1796_v56, %v1796_v56 }
 0xafc   :  { %v1799_v49 = vpop.f32.mrf.mxu0  ;;  %v3690_v50 = vpop.f32.mrf.mxu1 }
 0xafd   :  { %v3427_v51 = vpack.c.bf16 %v1798_v47, %v1798_v47  ;;  %v4706_v52 = vadd.f32 %v3690_v50, %v1629_v43  ;;  %v1800_v62 = vadd.f32 %v1799_v49, %v1621_v48  ;;  %v2090_v47 = vrot.slane %v2076_v30, %v4346_v19 }
 0xafe   :  { %v1801_v53 = vpop.f32.mrf.mxu0  ;;  %v1848_v54 = vpop.f32.mrf.mxu1 }
 0xaff   :  { %v1802_v55 = vadd.f32 %v1801_v53, %v1625_v41  ;;  %3693 = vmatpush3.bf16.xpose.msra.mxu1 %v3427_v51  ;;  %v1849_v0 = vadd.f32 %v1848_v54, %v1629_v43  ;;  %v3424_v6 = vpack.c.bf16 %v1800_v62, %v1800_v62 }
 0xb00   :  { %v1805_v57 = vpop.f32.mrf.mxu0  ;;  %v3691_v58 = vpop.f32.mrf.mxu1  ;;  %3704 = vmatprep.subr.bf16.mxu1 %v4082_v2 }
 0xb01   :  { %v3428_v8 = vpack.c.bf16 %v1802_v55, %v1802_v55  ;;  %v4709_v17 = vadd.f32 %v3691_v58, %v1629_v43  ;;  %v1806_v7 = vadd.f32 %v1805_v57, %v1621_v48  ;;  %v3431_v15 = vpack.c.bf16 %v1849_v0, %v1849_v0 }
 0xb02   :  { %v1807_v16 = vpop.f32.mrf.mxu0  ;;  %v1851_v4 = vpop.f32.mrf.mxu1 }
 0xb03   :  { %v1808_v59 = vadd.f32 %v1807_v16, %v1625_v41  ;;  %3699 = vmatpush3.bf16.xpose.msra.mxu0 %v3428_v8  ;;  %v1852_v18 = vadd.f32 %v1851_v4, %v1629_v43  ;;  %v3425_v20 = vpack.c.bf16 %v1806_v7, %v1806_v7  ;;  %v2159_v22 = vsel %vm704_vm4, %v3431_v15, 0 }
 0xb04   :  { %v1809_v9 = vpop.f32.mrf.mxu0  ;;  %3710 = vmatprep.subr.bf16.mxu0 %v4082_v2 }
 0xb05   :  { %v3429_v63 = vpack.c.bf16 %v1808_v59, %v1808_v59  ;;  %v1810_v21 = vadd.f32 %v1809_v9, %v1621_v48  ;;  %v3432_v12 = vpack.c.bf16 %v1852_v18, %v1852_v18  ;;  %v2077_v48 = vmul.f32 -1e+09, %v2073_v28 }
 0xb06   :  { %v1811_v3 = vpop.f32.mrf.mxu0  ;;  %3695 = vmatmul.mubr.bf16.vlgmr.msra.gmra.mxu1 %v3423_v61 }
 0xb07   :  { %v1812_v5 = vadd.f32 %v1811_v3, %v1625_v41  ;;  %3705 = vmatpush3.bf16.xpose.msra.mxu1 %v3429_v63  ;;  %3706 = vmatprep.mubr.msk.bf16.mxu1 %vm4083_vm0, %v4082_v2  ;;  %v3426_v24 = vpack.c.bf16 %v1810_v21, %v1810_v21  ;;  %v2205_v25 = vsel %vm704_vm4, %v3432_v12, 0  ;;  %v1293_v41 = vld [vmem:[%s5016_s3 + $0x3] sm:$0x1]  ;;  %v2094_v58 = vrot.slane %v2077_v48, %v4346_v19 }
 0xb08   :  { %3716 = vmatprep.subr.bf16.mxu1 %v4082_v2  ;;  %v2074_v49 = vsub.f32 1.0, %v1293_v41 }
 0xb09   :  { %v3430_v10 = vpack.c.bf16 %v1812_v5, %v1812_v5 }
 0xb0a   :  { %3701 = vmatmul.mubr.bf16.vlgmr.msra.gmra.mxu0 %v3424_v6  ;;  %v2078_v8 = vmul.f32 -1e+09, %v2074_v49 }
 0xb0b   :  { %3711 = vmatpush3.bf16.xpose.msra.mxu0 %v3430_v10  ;;  %3712 = vmatprep.mubr.msk.bf16.mxu0 %vm4083_vm0, %v4082_v2 }
 0xb0c   :  { %3722 = vmatprep.subr.bf16.mxu0 %v4082_v2  ;;  %v2098_v3 = vrot.slane %v2078_v8, %v4346_v19  ;;  %v3901_v8 = vld [vmem:[%s5022_s9 + $0x78] sm:$0xff]  }
 0xb0e   :  { %3707 = vmatmul.mubr.bf16.vlgmr.msra.gmra.mxu1 %v3425_v20 }
 0xb0f   :  { %3717 = vmatpush3.bf16.msra.mxu1 %v2159_v22  ;;  %3718 = vmatprep.mubr.msk.bf16.mxu1 %vm4083_vm0, %v4082_v2 }
 0xb10   :  { %3728 = vmatprep.subr.bf16.mxu1 %v4082_v2 }
 0xb12   :  { %3713 = vmatmul.mubr.bf16.vlgmr.msra.gmra.mxu0 %v3426_v24 }
 0xb13   :  { %3723 = vmatpush3.bf16.msra.mxu0 %v2205_v25  ;;  %3724 = vmatprep.mubr.msk.bf16.mxu0 %vm4083_vm0, %v4082_v2 }
 0xb14   :  { %3734 = vmatprep.subr.bf16.mxu0 %v4082_v2 }
 0xbc6   :  { %v1941_v39 = vpop.f32.mrf.mxu1 }
 0xbc7   :  { %v2067_v42 = vmul.f32 0.088388346, %v1941_v39 }
 0xbc8   :  { %v3696_v43 = vpop.f32.mrf.mxu1 }
 0xbc9   :  { %v2103_v46 = vadd.f32 %v2086_v36, %v2067_v42 }
 0xbca   :  { %v1944_v50 = vpop.f32.mrf.mxu1  ;;  %v1981_v51 = vpop.f32.mrf.mxu0 }
 0xbcb   :  { %v2068_v53 = vmul.f32 0.088388346, %v1981_v51  ;;  %v2107_v54 = vsel %vm676_vm5, %v2103_v46, -inf }
 0xbcc   :  { %v3702_v55 = vpop.f32.mrf.mxu0  ;;  %2108 = vmax.xlane.f32.xlu1 %v2107_v54  ;;  %v3697_v56 = vpop.f32.mrf.mxu1 }
 0xbcd   :  { %v2104_v57 = vadd.f32 %v2090_v47, %v2068_v53  ;;  %v3433_v56 = vpack.c.bf16 %v4706_v52, %v4706_v52 }
 0xbce   :  { %v1984_v16 = vpop.f32.mrf.mxu0  ;;  %v2021_v59 = vpop.f32.mrf.mxu1 }
 0xbcf   :  { %v2069_v61 = vmul.f32 0.088388346, %v2021_v59  ;;  %v2110_v62 = vsel %vm676_vm5, %v2104_v57, -inf  ;;  %v2251_v59 = vsel %vm704_vm4, %v3433_v56, 0 }
 0xbd0   :  { %2111 = vmax.xlane.f32.xlu0 %v2110_v62  ;;  %v3703_v9 = vpop.f32.mrf.mxu0  ;;  %v3708_v63 = vpop.f32.mrf.mxu1 }
 0xbd1   :  { %v2105_v0 = vadd.f32 %v2094_v58, %v2069_v61  ;;  %v3434_v61 = vpack.c.bf16 %v4709_v17, %v4709_v17 }
 0xbd2   :  { %v2024_v4 = vpop.f32.mrf.mxu1  ;;  %v2061_v5 = vpop.f32.mrf.mxu0 }
 0xbd3   :  { %v2070_v6 = vmul.f32 0.088388346, %v2061_v5  ;;  %v2113_v7 = vsel %vm676_vm5, %v2105_v0, -inf  ;;  %v2297_v63 = vsel %vm704_vm4, %v3434_v61, 0 }
 0xbd4   :  { %v3714_v10 = vpop.f32.mrf.mxu0  ;;  %2114 = vmax.xlane.f32.xlu1 %v2113_v7  ;;  %v3709_v15 = vpop.f32.mrf.mxu1  ;;  %v3903_v7 = vld [vmem:[%s5022_s9 + $0x68] sm:$0xff]  }
 0xbd5   :  { %v2106_v18 = vadd.f32 %v2098_v3, %v2070_v6  ;;  %v3902_v3 = vld [vmem:[%s5022_s9 + $0x70] sm:$0xff]   ;;  %v3904_v10 = vld [vmem:[%s5022_s9 + $0x60] sm:$0xff]   ;;  %v3905_v15 = vld [vmem:[%s5022_s9 + $0x58] sm:$0xff]  }
 0xbd6   :  { %v2064_v20 = vpop.f32.mrf.mxu0 }
 0xbd7   :  { %v2116_v21 = vsel %vm676_vm5, %v2106_v18, -inf  ;;  %v3907_v20 = vld [vmem:[%s5022_s9 + $0x48] sm:$0xff]  }
 0xbd8   :  { %2117 = vmax.xlane.f32.xlu0 %v2116_v21  ;;  %v3715_v22 = vpop.f32.mrf.mxu0  ;;  %v3908_v21 = vld [vmem:[%s5022_s9 + $0x40] sm:$0xff]  }
 0xc55   :  { %v2109_v12 = vpop.xlane.xlu1 %2108 }
 0xc56   :  { %v2119_v24 = vsub.f32 %v2103_v46, %v2109_v12 }
 0xc58   :  { %v2123_v25 = vmul.f32 1.442695, %v2119_v24 }
 0xc59   :  { %v2112_v26 = vpop.xlane.xlu0 %2111 }
 0xc5a   :  { %3981 = vpow2.f32 %v2123_v25  ;;  %v2120_v27 = vsub.f32 %v2104_v57, %v2112_v26 }
 0xc5c   :  { %v2125_v31 = vmul.f32 1.442695, %v2120_v27 }
 0xc5d   :  { %v2115_v32 = vpop.xlane.xlu1 %2114 }
 0xc5e   :  { %3983 = vpow2.f32 %v2125_v31  ;;  %v2121_v34 = vsub.f32 %v2105_v0, %v2115_v32 }
 0xc60   :  { %v2127_v35 = vmul.f32 1.442695, %v2121_v34 }
 0xc61   :  { %v2118_v36 = vpop.xlane.xlu0 %2117 }
 0xc62   :  { %3985 = vpow2.f32 %v2127_v35  ;;  %v2122_v30 = vsub.f32 %v2106_v18, %v2118_v36  ;;  %v3906_v18 = vld [vmem:[%s5022_s9 + $0x50] sm:$0xff]  }
 0xc64   :  { %v2129_v28 = vmul.f32 1.442695, %v2122_v30 }
 0xc66   :  { %3987 = vpow2.f32 %v2129_v28 }
 0xc67   :  { %v3982_v39 = vpop.eup %3981 }
 0xc68   :  { %v2131_v41 = vsel %vm676_vm5, %v3982_v39, 0.0 }
 0xc69   :  { %2132 = vadd.xlane.f32.xlu1 %v2131_v41 }
 0xc6b   :  { %v3984_v42 = vpop.eup %3983 }
 0xc6c   :  { %v2134_v43 = vsel %vm676_vm5, %v3984_v42, 0.0 }
 0xc6d   :  { %2135 = vadd.xlane.f32.xlu0 %v2134_v43 }
 0xc6f   :  { %v3986_v46 = vpop.eup %3985 }
 0xc70   :  { %v2137_v47 = vsel %vm676_vm5, %v3986_v46, 0.0 }
 0xc71   :  { %2138 = vadd.xlane.f32.xlu1 %v2137_v47 }
 0xc73   :  { %v3988_v48 = vpop.eup %3987 }
 0xc74   :  { %v2140_v49 = vsel %vm676_vm5, %v3988_v48, 0.0 }
 0xc75   :  { %2141 = vadd.xlane.f32.xlu0 %v2140_v49 }
 0xcf2   :  { %v2133_v50 = vpop.xlane.xlu1 %2132 }
 0xcf3   :  { %3989 = vrcp.f32 %v2133_v50 }
 0xcf6   :  { %v2136_v51 = vpop.xlane.xlu0 %2135 }
 0xcf7   :  { %3991 = vrcp.f32 %v2136_v51 }
 0xcfa   :  { %v2139_v53 = vpop.xlane.xlu1 %2138 }
 0xcfb   :  { %3993 = vrcp.f32 %v2139_v53 }
 0xcfe   :  { %v2142_v54 = vpop.xlane.xlu0 %2141 }
 0xcff   :  { %3995 = vrcp.f32 %v2142_v54 }
 0xd00   :  { %v3990_v55 = vpop.eup %3989 }
 0xd01   :  { %v2144_v57 = vmul.f32 %v3990_v55, %v3982_v39 }
 0xd03   :  { %v2151_v58 = vpack.c.bf16 %v2144_v57, %v2144_v57 }
 0xd04   :  { %v3992_v16 = vpop.eup %3991 }
 0xd05   :  { %3719 = vmatmul.mubr.msk.bf16.vlgmr.msra.gmra.mxu1 %vm676_vm5, %v2151_v58  ;;  %v2146_v62 = vmul.f32 %v3992_v16, %v3984_v42 }
 0xd06   :  { %3729 = vmatpush3.bf16.msra.mxu1 %v2251_v59  ;;  %3730 = vmatprep.mubr.msk.bf16.mxu1 %vm4083_vm0, %v4082_v2  ;;  %v3909_v59 = vld [vmem:[%s5024_s11 + $0xf0] ss:$8 sps:$4 sm:$0xff]  }
 0xd07   :  { %v2152_v52 = vpack.c.bf16 %v2146_v62, %v2146_v62  ;;  %3740 = vmatprep.subr.bf16.mxu1 %v3901_v8 }
 0xd08   :  { %v3994_v9 = vpop.eup %3993 }
 0xd09   :  { %3725 = vmatmul.mubr.msk.bf16.vlgmr.msra.gmra.mxu0 %vm676_vm5, %v2152_v52  ;;  %v2148_v0 = vmul.f32 %v3994_v9, %v3986_v46 }
 0xd0a   :  { %3735 = vmatpush3.bf16.msra.mxu0 %v2297_v63  ;;  %3736 = vmatprep.mubr.msk.bf16.mxu0 %vm4083_vm0, %v4082_v2 }
 0xd0b   :  { %v2153_v17 = vpack.c.bf16 %v2148_v0, %v2148_v0 }
 0xd0c   :  { %v3996_v4 = vpop.eup %3995 }
 0xd0d   :  { %3731 = vmatmul.mubr.msk.bf16.vlgmr.msra.gmra.mxu1 %vm676_vm5, %v2153_v17  ;;  %v2150_v5 = vmul.f32 %v3996_v4, %v3988_v48  ;;  %v3371_v48 = vld [vmem:[%s5023_s10 + $0x1] ss:$0 sm:$0xff] }
 0xd0e   :  { %3741 = vmatpush3.bf16.msra.mxu1 %v3901_v8 }
 0xd0f   :  { %v2154_v6 = vpack.c.bf16 %v2150_v5, %v2150_v5  ;;  %3742 = vmatprep.subr.bf16.mxu1 %v3902_v3 }
 0xd11   :  { %3737 = vmatmul.mubr.msk.bf16.vlgmr.msra.gmra.mxu0 %vm676_vm5, %v2154_v6 }
 0xd12   :  { %3743 = vmatpush3.bf16.msra.mxu1 %v3902_v3  ;;  %2637 = vmatprep.mubr.bf16.mxu0 %v4081_v1 }
 0xd13   :  { %3744 = vmatprep.subr.bf16.mxu1 %v3903_v7 }
 0xd16   :  { %3745 = vmatpush3.bf16.msra.mxu1 %v3903_v7 }
 0xd17   :  { %3746 = vmatprep.subr.bf16.mxu1 %v3904_v10 }
 0xd1a   :  { %3747 = vmatpush3.bf16.msra.mxu1 %v3904_v10 }
 0xd1b   :  { %3748 = vmatprep.subr.bf16.mxu1 %v3905_v15 }
 0xd1e   :  { %3749 = vmatpush3.bf16.msra.mxu1 %v3905_v15  ;;  %v3914_v15 = vld [vmem:[%s5024_s11 + $0xe4] ss:$8 sps:$4 sm:$0xff]  }
 0xd1f   :  { %3750 = vmatprep.subr.bf16.mxu1 %v3906_v18 }
 0xd22   :  { %3751 = vmatpush3.bf16.msra.mxu1 %v3906_v18  ;;  %v3912_v18 = vld [vmem:[%s5024_s11 + $0xe0] ss:$8 sps:$4 sm:$0xff]  }
 0xd23   :  { %3752 = vmatprep.subr.bf16.mxu1 %v3907_v20 }
 0xd26   :  { %3753 = vmatpush3.bf16.msra.mxu1 %v3907_v20  ;;  %v3917_v20 = vld [vmem:[%s5024_s11 + $0xd4] ss:$8 sps:$4 sm:$0xff]  }
 0xd27   :  { %3754 = vmatprep.subr.bf16.mxu1 %v3908_v21 }
 0xd2a   :  { %3755 = vmatpush3.bf16.msra.mxu1 %v3908_v21  ;;  %v3915_v21 = vld [vmem:[%s5024_s11 + $0xd0] ss:$8 sps:$4 sm:$0xff]  }
 0xdc5   :  { %v2195_v22 = vpop.f32.mrf.mxu1 }
 0xdc7   :  { %v3720_v12 = vpop.f32.mrf.mxu1 }
 0xdc8   :  { %v3918_v12 = vld [vmem:[%s5024_s11 + $0xc0] ss:$8 sps:$4 sm:$0xff]  }
 0xdc9   :  { %v2198_v24 = vpop.f32.mrf.mxu1  ;;  %v2241_v25 = vpop.f32.mrf.mxu0 }
 0xdca   :  { %v2339_v26 = vpack.c.bf16 %v2241_v25, %v2195_v22  ;;  %v3920_v22 = vld [vmem:[%s5024_s11 + $0xc4] ss:$8 sps:$4 sm:$0xff]   ;;  %v3921_v24 = vld [vmem:[%s5024_s11 + $0xb0] ss:$8 sps:$4 sm:$0xff]   ;;  %v3923_v25 = vld [vmem:[%s5024_s11 + $0xb4] ss:$8 sps:$4 sm:$0xff]  }
 0xdcb   :  { %v3721_v27 = vpop.f32.mrf.mxu1  ;;  %v3726_v31 = vpop.f32.mrf.mxu0 }
 0xdcc   :  { %3756 = vmatprep.mubr.bf16.mxu1 %v2339_v26  ;;  %v3926_v26 = vld [vmem:[%s5024_s11 + $0xa4] ss:$8 sps:$4 sm:$0xff]   ;;  %v3924_v27 = vld [vmem:[%s5024_s11 + $0xa0] ss:$8 sps:$4 sm:$0xff]   ;;  %v3929_v31 = vld [vmem:[%s5024_s11 + $0x94] ss:$8 sps:$4 sm:$0xff]  }
 0xdcd   :  { %v2244_v32 = vpop.f32.mrf.mxu0  ;;  %v2287_v34 = vpop.f32.mrf.mxu1 }
 0xdce   :  { %v3927_v32 = vld [vmem:[%s5024_s11 + $0x90] ss:$8 sps:$4 sm:$0xff]  }
 0xdcf   :  { %v3727_v35 = vpop.f32.mrf.mxu0  ;;  %v3732_v36 = vpop.f32.mrf.mxu1 }
 0xdd0   :  { %v3930_v35 = vld [vmem:[%s5024_s11 + $0x80] ss:$8 sps:$4 sm:$0xff]  }
 0xdd1   :  { %v2290_v30 = vpop.f32.mrf.mxu1  ;;  %v2333_v28 = vpop.f32.mrf.mxu0 }
 0xdd2   :  { %v2340_v39 = vpack.c.bf16 %v2333_v28, %v2287_v34  ;;  %v3932_v34 = vld [vmem:[%s5024_s11 + $0x84] ss:$8 sps:$4 sm:$0xff]  }
 0xdd3   :  { %v3733_v41 = vpop.f32.mrf.mxu1  ;;  %v3738_v42 = vpop.f32.mrf.mxu0 }
 0xdd4   :  { %3757 = vmatmul.mubr.bf16.vlgmr.msra.gmra.mxu1 %v2340_v39 }
 0xdd5   :  { %v2336_v43 = vpop.f32.mrf.mxu0 }
 0xdd7   :  { %v3739_v46 = vpop.f32.mrf.mxu0 }
 0xe94   :  { %v3758_v47 = vpop.f32.mrf.mxu1 }
 0xe95   :  { %v2438_v53 = vadd.f32 %v3758_v47, %v3371_v48 }
 0xe96   :  { %v2429_v49 = vpop.f32.mrf.mxu1 }
 0xe97   :  { %v2430_v50 = vadd.f32 %v3371_v48, %v2429_v49  ;;  %v2446_v8 = vadd.f32 %v2438_v53, %v4684_v37 }
 0xe98   :  { %v3759_v51 = vpop.f32.mrf.mxu1 }
 0xe99   :  { %v2444_v54 = vadd.f32 %v2430_v50, %v4677_v33  ;;  %v2441_v57 = vadd.f32 %v3759_v51, %v3371_v48  ;;  %v3911_v33 = vld [vmem:[%s5024_s11 + $0xf4] ss:$8 sps:$4 sm:$0xff]  }
 0xe9a   :  { %v2432_v55 = vpop.f32.mrf.mxu1  ;;  %2605 = vmatprep.subr.bf16.mxu0 %v3911_v33 }
 0xe9b   :  { %v2433_v56 = vadd.f32 %v3371_v48, %v2432_v55  ;;  %2448 = vadd.xlane.f32.xlu1 %v2444_v54  ;;  %v2447_v16 = vadd.f32 %v2441_v57, %v4686_v38  ;;  %2606 = vmatpush1.bf16.msra.mxu0 %v3909_v59 }
 0xe9c   :  { %2607 = vmatprep.subr.bf16.mxu0 %v3914_v15  ;;  %v3942_v15 = vld [vmem:[%s5026_s13 + $0x98] sm:$0xff]  }
 0xe9d   :  { %v2445_v58 = vadd.f32 %v2433_v56, %v4679_v23 }
 0xe9f   :  { %2450 = vadd.xlane.f32.xlu0 %v2445_v58  ;;  %2452 = vadd.xlane.f32.xlu1 %v2446_v8 }
 0xea0   :  { %2608 = vmatpush1.bf16.msra.mxu0 %v3912_v18  ;;  %v3943_v18 = vld [vmem:[%s5026_s13 + $0xd0] sm:$0xff]  }
 0xea1   :  { %2609 = vmatprep.subr.bf16.mxu0 %v3917_v20  ;;  %v3944_v20 = vld [vmem:[%s5026_s13 + $0x90] sm:$0xff]  }
 0xea3   :  { %2454 = vadd.xlane.f32.xlu0 %v2447_v16 }
 0xea4   :  { %2610 = vmatpush1.bf16.msra.mxu0 %v3915_v21  ;;  %v3945_v21 = vld [vmem:[%s5026_s13 + $0xc8] sm:$0xff]  }
 0xea5   :  { %2611 = vmatprep.subr.bf16.mxu0 %v3920_v22  ;;  %v3946_v22 = vld [vmem:[%s5026_s13 + $0x88] sm:$0xff]  }
 0xea8   :  { %2612 = vmatpush1.bf16.msra.mxu0 %v3918_v12  ;;  %v3947_v12 = vld [vmem:[%s5026_s13 + $0xc0] sm:$0xff]  }
 0xea9   :  { %2613 = vmatprep.subr.bf16.mxu0 %v3923_v25  ;;  %v3283_v25 = vld [vmem:[%s5025_s12 + $0x2] sm:$0x3] }
 0xeac   :  { %2614 = vmatpush1.bf16.msra.mxu0 %v3921_v24  ;;  %v3948_v24 = vld [vmem:[%s5026_s13 + $0x80] sm:$0xff]  }
 0xead   :  { %2615 = vmatprep.subr.bf16.mxu0 %v3926_v26  ;;  %v2518_v26 = vrot.slane %v3283_v25, %v4346_v19 }
 0xeb0   :  { %2616 = vmatpush1.bf16.msra.mxu0 %v3924_v27  ;;  %v2522_v27 = vrot.slane %v3283_v25, %v4338_v13 }
 0xeb1   :  { %2617 = vmatprep.subr.bf16.mxu0 %v3929_v31 }
 0xeb4   :  { %2618 = vmatpush1.bf16.msra.mxu0 %v3927_v32 }
 0xeb5   :  { %2619 = vmatprep.subr.bf16.mxu0 %v3932_v34 }
 0xeb8   :  { %2620 = vmatpush1.bf16.msra.mxu0 %v3930_v35 }
 0xeb9   :  { %3760 = vmatprep.subr.mxu0 %v4082_v2 }
 0xf24   :  { %v2449_v61 = vpop.xlane.xlu1 %2448 }
 0xf25   :  { %v2456_v62 = vmul.f32 0.0078125, %v2449_v61 }
 0xf27   :  { %v4802_v23 = vsub.f32 %v2444_v54, %v2456_v62  ;;  %v3380_v54 = vld [vmem:[%s5019_s6 + $0x8] ss:$0 sm:$0xff] }
 0xf28   :  { %v2451_v37 = vpop.xlane.xlu0 %2450  ;;  %v2453_v52 = vpop.xlane.xlu1 %2452 }
 0xf29   :  { %v2457_v9 = vmul.f32 0.0078125, %v2451_v37  ;;  %v2458_v63 = vmul.f32 0.0078125, %v2453_v52  ;;  %v2464_v38 = vmul.f32 %v4802_v23, %v4802_v23 }
 0xf2b   :  { %v2461_v0 = vsub.f32 %v2445_v58, %v2457_v9  ;;  %v4806_v17 = vsub.f32 %v2446_v8, %v2458_v63  ;;  %2468 = vadd.xlane.f32.xlu1 %v2464_v38  ;;  %v3381_v8 = vld [vmem:[%s5019_s6 + $0x9] ss:$0 sm:$0xff] }
 0xf2c   :  { %v2455_v3 = vpop.xlane.xlu0 %2454 }
 0xf2d   :  { %v2459_v4 = vmul.f32 0.0078125, %v2455_v3  ;;  %v2465_v5 = vmul.f32 %v2461_v0, %v2461_v0  ;;  %v2466_v6 = vmul.f32 %v4806_v17, %v4806_v17  ;;  %v3934_v3 = vld [vmem:[%s5026_s13 + $0xb8] sm:$0xff]  }
 0xf2f   :  { %v4810_v7 = vsub.f32 %v2447_v16, %v2459_v4  ;;  %2470 = vadd.xlane.f32.xlu0 %v2465_v5  ;;  %2472 = vadd.xlane.f32.xlu1 %v2466_v6  ;;  %v3936_v4 = vld [vmem:[%s5026_s13 + $0xb0] sm:$0xff]   ;;  %v3938_v5 = vld [vmem:[%s5026_s13 + $0xa8] sm:$0xff]   ;;  %v3939_v6 = vld [vmem:[%s5026_s13 + $0xe0] sm:$0xff]  }
 0xf31   :  { %v2467_v10 = vmul.f32 %v4810_v7, %v4810_v7 }
 0xf33   :  { %2474 = vadd.xlane.f32.xlu0 %v2467_v10  ;;  %v3941_v10 = vld [vmem:[%s5026_s13 + $0xd8] sm:$0xff]  }
 0xfb4   :  { %v2469_v36 = vpop.xlane.xlu1 %2468 }
 0xfb5   :  { %v2476_v30 = vmul.f32 0.0078125, %v2469_v36 }
 0xfb7   :  { %v2480_v28 = vadd.f32 1e-12, %v2476_v30 }
 0xfb8   :  { %v2471_v39 = vpop.xlane.xlu0 %2470  ;;  %v2473_v41 = vpop.xlane.xlu1 %2472 }
 0xfb9   :  { %3997 = vrsqrt.f32 %v2480_v28  ;;  %v2477_v42 = vmul.f32 0.0078125, %v2471_v39  ;;  %v2478_v43 = vmul.f32 0.0078125, %v2473_v41 }
 0xfbb   :  { %v2481_v46 = vadd.f32 1e-12, %v2477_v42  ;;  %v2482_v47 = vadd.f32 1e-12, %v2478_v43 }
 0xfbc   :  { %v2475_v48 = vpop.xlane.xlu0 %2474 }
 0xfbd   :  { %3999 = vrsqrt.f32 %v2481_v46  ;;  %v2479_v49 = vmul.f32 0.0078125, %v2475_v48 }
 0xfbe   :  { %4001 = vrsqrt.f32 %v2482_v47 }
 0xfbf   :  { %v2483_v50 = vadd.f32 1e-12, %v2479_v49 }
 0xfc1   :  { %4003 = vrsqrt.f32 %v2483_v50 }
 0xfc6   :  { %v3998_v51 = vpop.eup %3997 }
 0xfc7   :  { %v2488_v53 = vmul.f32 %v3998_v51, %v4802_v23 }
 0xfc9   :  { %v2498_v57 = vmul.f32 %v3380_v54, %v2488_v53 }
 0xfca   :  { %v4000_v55 = vpop.eup %3999 }
 0xfcb   :  { %v2489_v56 = vmul.f32 %v4000_v55, %v2461_v0  ;;  %v4002_v58 = vpop.eup %4001  ;;  %v4864_v33 = vadd.f32 %v3381_v8, %v2498_v57 }
 0xfcc   :  { %v2490_v62 = vmul.f32 %v4002_v58, %v4806_v17  ;;  %v3933_v17 = vld [vmem:[%s5026_s13 + $0xf8] sm:$0xff]  }
 0xfcd   :  { %v2499_v16 = vmul.f32 %v3380_v54, %v2489_v56  ;;  %3538 = vmatprep.subr.bf16.mxu1 %v3933_v17 }
 0xfce   :  { %v4004_v59 = vpop.eup %4003  ;;  %v2500_v9 = vmul.f32 %v3380_v54, %v2490_v62  ;;  %3539 = vmatpush3.bf16.msra.mxu1 %v3934_v3 }
 0xfcf   :  { %v4866_v61 = vadd.f32 %v3381_v8, %v2499_v16  ;;  %v2491_v23 = vmul.f32 %v4004_v59, %v4810_v7  ;;  %v3940_v7 = vld [vmem:[%s5026_s13 + $0xa0] sm:$0xff]  }
 0xfd0   :  { %v4875_v38 = vadd.f32 %v3381_v8, %v2500_v9 }
 0xfd1   :  { %v2512_v37 = vpack.c.bf16 %v4866_v61, %v4864_v33  ;;  %v2501_v52 = vmul.f32 %v3380_v54, %v2491_v23 }
 0xfd3   :  { %2638 = vmatmul.mubr.bf16.vlgmr.msra.gmra.mxu0 %v2512_v37  ;;  %v4873_v63 = vadd.f32 %v3381_v8, %v2501_v52 }
 0xfd4   :  { %2647 = vmatprep.mubr.bf16.mxu0 %v4081_v1  ;;  %v3935_v1 = vld [vmem:[%s5026_s13 + $0xf0] sm:$0xff]  }
 0xfd5   :  { %v2513_v0 = vpack.c.bf16 %v4873_v63, %v4875_v38  ;;  %3540 = vmatprep.subr.bf16.mxu1 %v3935_v1 }
 0xfd6   :  { %3541 = vmatpush3.bf16.msra.mxu1 %v3936_v4 }
 0xfdb   :  { %2648 = vmatmul.mubr.bf16.gmra.mxu0 %v2513_v0 }
 0xfdc   :  { %3762 = vmatprep.mubr.msk.f32.mxu0 %vm4083_vm0, %v4082_v2  ;;  %v3937_v2 = vld [vmem:[%s5026_s13 + $0xe8] sm:$0xff]  }
 0xfdd   :  { %3542 = vmatprep.subr.bf16.mxu1 %v3937_v2 }
 0xfde   :  { %3543 = vmatpush3.bf16.msra.mxu1 %v3938_v5 }
 0xfdf   :  { %3544 = vmatprep.subr.bf16.mxu1 %v3939_v6 }
 0xfe2   :  { %3545 = vmatpush3.bf16.msra.mxu1 %v3940_v7 }
 0xfe3   :  { %3546 = vmatprep.subr.bf16.mxu1 %v3941_v10 }
 0xfe6   :  { %3547 = vmatpush3.bf16.msra.mxu1 %v3942_v15 }
 0xfe7   :  { %3548 = vmatprep.subr.bf16.mxu1 %v3943_v18 }
 0xfea   :  { %3549 = vmatpush3.bf16.msra.mxu1 %v3944_v20 }
 0xfeb   :  { %3550 = vmatprep.subr.bf16.mxu1 %v3945_v21 }
 0xfee   :  { %3551 = vmatpush3.bf16.msra.mxu1 %v3946_v22 }
 0xfef   :  { %3552 = vmatprep.subr.bf16.mxu1 %v3947_v12 }
 0xff2   :  { %3553 = vmatpush3.bf16.msra.mxu1 %v3948_v24 }
0x1093   :  { %v2639_v31 = vpop.f32.mrf.mxu0 }
0x1094   :  { %v4934_v32 = vadd.f32 %v2639_v31, %v2518_v26 }
0x1095   :  { %v2641_v34 = vpop.f32.mrf.mxu0 }
0x1096   :  { %v2658_v35 = vmul.f32 %v4934_v32, %v4934_v32  ;;  %v4938_v36 = vadd.f32 %v2641_v34, %v2522_v27 }
0x1097   :  { %v2643_v30 = vpop.f32.mrf.mxu0 }
0x1098   :  { %v2666_v28 = vmul.f32 %v2658_v35, %v4934_v32  ;;  %v2659_v39 = vmul.f32 %v4938_v36, %v4938_v36  ;;  %v4943_v41 = vadd.f32 %v2643_v30, %v2518_v26 }
0x1099   :  { %v2645_v19 = vpop.f32.mrf.mxu0 }
0x109a   :  { %v2674_v42 = vmul.f32 0.044715, %v2666_v28  ;;  %v2667_v13 = vmul.f32 %v2659_v39, %v4938_v36  ;;  %v2660_v43 = vmul.f32 %v4943_v41, %v4943_v41  ;;  %v4948_v46 = vadd.f32 %v2645_v19, %v2522_v27 }
0x109b   :  { %v2649_v47 = vpop.f32.mrf.mxu0 }
0x109c   :  { %v2682_v48 = vadd.f32 %v2674_v42, %v4934_v32  ;;  %v2675_v49 = vmul.f32 0.044715, %v2667_v13  ;;  %v2668_v50 = vmul.f32 %v2660_v43, %v4943_v41  ;;  %v2661_v51 = vmul.f32 %v4948_v46, %v4948_v46 }
0x109d   :  { %v4954_v53 = vadd.f32 %v2649_v47, %v2518_v26  ;;  %v2651_v54 = vpop.f32.mrf.mxu0 }
0x109e   :  { %v2690_v55 = vmul.f32 0.7978846, %v2682_v48  ;;  %v2683_v56 = vadd.f32 %v2675_v49, %v4938_v36  ;;  %v2676_v57 = vmul.f32 0.044715, %v2668_v50  ;;  %v2669_v58 = vmul.f32 %v2661_v51, %v4948_v46 }
0x109f   :  { %v2662_v8 = vmul.f32 %v4954_v53, %v4954_v53  ;;  %v4960_v16 = vadd.f32 %v2651_v54, %v2522_v27  ;;  %v2653_v59 = vpop.f32.mrf.mxu0 }
0x10a0   :  { %v2691_v62 = vmul.f32 0.7978846, %v2683_v56  ;;  %v2684_v23 = vadd.f32 %v2676_v57, %v4943_v41  ;;  %v2677_v37 = vmul.f32 0.044715, %v2669_v58  ;;  %4005 = vtanh.f32 %v2690_v55 }
0x10a1   :  { %v2670_v52 = vmul.f32 %v2662_v8, %v4954_v53  ;;  %v2663_v9 = vmul.f32 %v4960_v16, %v4960_v16  ;;  %v2654_v0 = vadd.f32 %v2653_v59, %v2518_v26  ;;  %v2655_v17 = vpop.f32.mrf.mxu0 }
0x10a2   :  { %4007 = vtanh.f32 %v2691_v62  ;;  %v2692_v3 = vmul.f32 0.7978846, %v2684_v23  ;;  %v2685_v1 = vadd.f32 %v2677_v37, %v4948_v46  ;;  %v2656_v4 = vadd.f32 %v2655_v17, %v2522_v27 }
0x10a3   :  { %v2678_v2 = vmul.f32 0.044715, %v2670_v52  ;;  %v2671_v5 = vmul.f32 %v2663_v9, %v4960_v16  ;;  %v2664_v6 = vmul.f32 %v2654_v0, %v2654_v0 }
0x10a4   :  { %4009 = vtanh.f32 %v2692_v3  ;;  %v2693_v7 = vmul.f32 0.7978846, %v2685_v1  ;;  %v2665_v10 = vmul.f32 %v2656_v4, %v2656_v4 }
0x10a5   :  { %v2686_v15 = vadd.f32 %v2678_v2, %v4954_v53  ;;  %v2679_v18 = vmul.f32 0.044715, %v2671_v5  ;;  %v2672_v20 = vmul.f32 %v2664_v6, %v2654_v0 }
0x10a6   :  { %4011 = vtanh.f32 %v2693_v7  ;;  %v2673_v21 = vmul.f32 %v2665_v10, %v2656_v4 }
0x10a7   :  { %v2694_v22 = vmul.f32 0.7978846, %v2686_v15  ;;  %v2687_v12 = vadd.f32 %v2679_v18, %v4960_v16  ;;  %v2680_v24 = vmul.f32 0.044715, %v2672_v20 }
0x10a8   :  { %v2681_v25 = vmul.f32 0.044715, %v2673_v21 }
0x10a9   :  { %4013 = vtanh.f32 %v2694_v22  ;;  %v2695_v26 = vmul.f32 0.7978846, %v2687_v12  ;;  %v2688_v27 = vadd.f32 %v2680_v24, %v2654_v0  ;;  %v3398_v24 = vld [vmem:[%s5027_s14 + $0x1] ss:$0 sm:$0xff] }
0x10aa   :  { %v2689_v31 = vadd.f32 %v2681_v25, %v2656_v4 }
0x10ab   :  { %4015 = vtanh.f32 %v2695_v26  ;;  %v2696_v34 = vmul.f32 0.7978846, %v2688_v27 }
0x10ac   :  { %v2697_v35 = vmul.f32 0.7978846, %v2689_v31 }
0x10ad   :  { %4017 = vtanh.f32 %v2696_v34  ;;  %v4006_v30 = vpop.eup %4005 }
0x10ae   :  { %4019 = vtanh.f32 %v2697_v35  ;;  %v2706_v42 = vadd.f32 1.0, %v4006_v30  ;;  %v3175_v35 = vld [vmem:[%s5027_s14] ss:$0 sm:$0xff] }
0x10af   :  { %v4008_v28 = vpop.eup %4007 }
0x10b0   :  { %v2707_v39 = vadd.f32 1.0, %v4008_v28  ;;  %v2714_v50 = vmul.f32 0.5, %v2706_v42 }
0x10b1   :  { %v4010_v19 = vpop.eup %4009 }
0x10b2   :  { %v2708_v13 = vadd.f32 1.0, %v4010_v19  ;;  %v2715_v49 = vmul.f32 0.5, %v2707_v39  ;;  %v2722_v8 = vmul.f32 %v2714_v50, %v4934_v32 }
0x10b3   :  { %v4012_v43 = vpop.eup %4011 }
0x10b4   :  { %v2716_v47 = vmul.f32 0.5, %v2708_v13  ;;  %v2709_v48 = vadd.f32 1.0, %v4012_v43  ;;  %v2723_v57 = vmul.f32 %v2715_v49, %v4938_v36 }
0x10b6   :  { %v4014_v51 = vpop.eup %4013  ;;  %v2717_v54 = vmul.f32 0.5, %v2709_v48  ;;  %v2724_v55 = vmul.f32 %v2716_v47, %v4943_v41 }
0x10b7   :  { %v2710_v62 = vadd.f32 1.0, %v4014_v51 }
0x10b8   :  { %v4016_v56 = vpop.eup %4015  ;;  %v2725_v58 = vmul.f32 %v2717_v54, %v4948_v46  ;;  %v2730_v9 = vpack.c.bf16 %v2724_v55, %v2722_v8 }
0x10b9   :  { %v2711_v59 = vadd.f32 1.0, %v4016_v56  ;;  %v2718_v2 = vmul.f32 0.5, %v2710_v62 }
0x10ba   :  { %v4018_v23 = vpop.eup %4017  ;;  %v2731_v37 = vpack.c.bf16 %v2725_v58, %v2723_v57 }
0x10bb   :  { %v4020_v52 = vpop.eup %4019  ;;  %v2712_v17 = vadd.f32 1.0, %v4018_v23  ;;  %v2719_v1 = vmul.f32 0.5, %v2711_v59  ;;  %v2726_v32 = vmul.f32 %v2718_v2, %v4954_v53  ;;  %v3491_v53 = vadd.f32 %v4700_v40, %v4695_v29 }
0x10bc   :  { %2868 = vmatprep.mubr.bf16.mxu1 %v2731_v37  ;;  %v2713_v3 = vadd.f32 1.0, %v4020_v52  ;;  %v1240_v29 = vadd.f32 %v4666_v60, %v3175_v35 }
0x10bd   :  { %2869 = vmatmul.mubr.bf16.vlgmr.msra.gmra.mxu1 %v2730_v9  ;;  %v2720_v41 = vmul.f32 0.5, %v2712_v17  ;;  %v2727_v36 = vmul.f32 %v2719_v1, %v4960_v16  ;;  %v1243_v28 = vadd.f32 %v3491_v53, %v3175_v35 }
0x10be   :  { %v2721_v5 = vmul.f32 0.5, %v2713_v3  ;;  %v1246_v43 = vadd.f32 %v1240_v29, %v4486_v44 }
0x10bf   :  { %v2728_v6 = vmul.f32 %v2720_v41, %v2654_v0 }
0x10c0   :  { %v2729_v46 = vmul.f32 %v2721_v5, %v2656_v4 }
0x10c1   :  { %v2732_v10 = vpack.c.bf16 %v2728_v6, %v2726_v32 }
0x10c2   :  { %v2733_v7 = vpack.c.bf16 %v2729_v46, %v2727_v36 }
0x10c4   :  { %2876 = vmatprep.mubr.bf16.mxu1 %v2733_v7 }
0x10c5   :  { %2877 = vmatmul.mubr.bf16.gmra.mxu1 %v2732_v10 }
0x117d   :  { %v3554_v15 = vpop.f32.mrf.mxu1 }
0x117f   :  { %v3555_v18 = vpop.f32.mrf.mxu1 }
0x1180   :  { %v3556_v22 = vadd.f32 %v3555_v18, %v3554_v15 }
0x1181   :  { %v3557_v20 = vpop.f32.mrf.mxu1 }
0x1182   :  { %v2871_v4 = vadd.f32 %v3556_v22, %v3398_v24 }
0x1183   :  { %v3558_v21 = vpop.f32.mrf.mxu1 }
0x1184   :  { %v3559_v12 = vadd.f32 %v3558_v21, %v3557_v20  ;;  %v2885_v19 = vadd.f32 %v2871_v4, %v4864_v33 }
0x1185   :  { %v3560_v0 = vpop.f32.mrf.mxu1 }
0x1186   :  { %v2874_v25 = vadd.f32 %v3559_v12, %v3398_v24 }
0x1187   :  { %v3561_v16 = vpop.f32.mrf.mxu1 }
0x1188   :  { %v3562_v26 = vadd.f32 %v3561_v16, %v3560_v0  ;;  %v2886_v27 = vadd.f32 %v2874_v25, %v4866_v61  ;;  %v1247_v61 = vadd.f32 %v1243_v28, %v4488_v45  ;;  %v3415_v16 = vld [vmem:[%s5019_s6 + $0xa] ss:$0 sm:$0xff] }
0x1189   :  { %v3563_v31 = vpop.f32.mrf.mxu1 }
0x118a   :  { %v2879_v34 = vadd.f32 %v3562_v26, %v3398_v24  ;;  %2891 = vadd.xlane.f32.xlu1 %v2886_v27 }
0x118b   :  { %v3564_v30 = vpop.f32.mrf.mxu1 }
0x118c   :  { %v3565_v39 = vadd.f32 %v3564_v30, %v3563_v31  ;;  %v2887_v42 = vadd.f32 %v2879_v34, %v4875_v38  ;;  %v3416_v31 = vld [vmem:[%s5019_s6 + $0xb] ss:$0 sm:$0xff] }
0x118e   :  { %v2882_v13 = vadd.f32 %v3565_v39, %v3398_v24  ;;  %2889 = vadd.xlane.f32.xlu1 %v2885_v19  ;;  %2893 = vadd.xlane.f32.xlu0 %v2887_v42 }
0x1190   :  { %v2888_v40 = vadd.f32 %v2882_v13, %v4873_v63 }
0x1192   :  { %2895 = vadd.xlane.f32.xlu0 %v2888_v40  ;;  %1250 = vadd.xlane.f32.xlu1 %v1247_v61 }
0x1196   :  { %1248 = vadd.xlane.f32.xlu0 %v1246_v43 }
0x1213   :  { %v2892_v47 = vpop.xlane.xlu1 %2891 }
0x1214   :  { %v2898_v48 = vmul.f32 0.0078125, %v2892_v47 }
0x1216   :  { %v2902_v49 = vsub.f32 %v2886_v27, %v2898_v48 }
0x1217   :  { %v2894_v33 = vpop.xlane.xlu0 %2893  ;;  %v2890_v50 = vpop.xlane.xlu1 %2889 }
0x1218   :  { %v2899_v38 = vmul.f32 0.0078125, %v2894_v33  ;;  %v2897_v51 = vmul.f32 0.0078125, %v2890_v50  ;;  %v2906_v54 = vmul.f32 %v2902_v49, %v2902_v49 }
0x121a   :  { %v2903_v55 = vsub.f32 %v2887_v42, %v2899_v38  ;;  %v2901_v56 = vsub.f32 %v2885_v19, %v2897_v51  ;;  %2911 = vadd.xlane.f32.xlu1 %v2906_v54  ;;  %v3192_v19 = vld [vmem:[%s5019_s6 + $0x4] ss:$0 sm:$0xff] }
0x121b   :  { %v2896_v60 = vpop.xlane.xlu0 %2895  ;;  %v1251_v63 = vpop.xlane.xlu1 %1250 }
0x121c   :  { %v2900_v57 = vmul.f32 0.0078125, %v2896_v60  ;;  %v1253_v45 = vmul.f32 0.0078125, %v1251_v63  ;;  %v2905_v58 = vmul.f32 %v2901_v56, %v2901_v56  ;;  %v2907_v8 = vmul.f32 %v2903_v55, %v2903_v55 }
0x121e   :  { %v2904_v59 = vsub.f32 %v2888_v40, %v2900_v57  ;;  %v1255_v44 = vsub.f32 %v1247_v61, %v1253_v45  ;;  %2909 = vadd.xlane.f32.xlu1 %v2905_v58  ;;  %2913 = vadd.xlane.f32.xlu0 %v2907_v8 }
0x121f   :  { %v1249_v62 = vpop.xlane.xlu0 %1248 }
0x1220   :  { %v1252_v23 = vmul.f32 0.0078125, %v1249_v62  ;;  %v1257_v37 = vmul.f32 %v1255_v44, %v1255_v44  ;;  %v2908_v52 = vmul.f32 %v2904_v59, %v2904_v59 }
0x1222   :  { %v1254_v9 = vsub.f32 %v1246_v43, %v1252_v23  ;;  %1260 = vadd.xlane.f32.xlu1 %v1257_v37  ;;  %2915 = vadd.xlane.f32.xlu0 %v2908_v52  ;;  %v3193_v43 = vld [vmem:[%s5019_s6 + $0x5] ss:$0 sm:$0xff]  ;;  %s4085_s6 = smov [#allocation2]  }
0x1223   :  { %s3082_s24 = sshll.u32 %s4085_s6, 4  ;;  %s3083_s24 = int_to_ptr.vmem [resolvable:$true] %s3082_s24 }
0x1224   :  { %v1256_v17 = vmul.f32 %v1254_v9, %v1254_v9  ;;  %s4037_s3 = scalar_lea.vmem %s3083_s24, 32  ;;  %p4042_p1 = scmp.lt.s32.totalorder %s3083_s24, %s3083_s24 }
0x1225   :  { %p4038_p0 = scmp.ne.s32.totalorder %s3083_s24, %s4037_s3  ;;  %p4043_p2 = scmp.lt.s32.totalorder %s4037_s3, %s4037_s3 }
0x1226   :  { %1258 = vadd.xlane.f32.xlu0 %v1256_v17 }
0x1227   :  { %p4044_p3 = por %p4043_p2, %p4042_p1 }
0x1229   :  { %p4045_p4 = pnand %p4044_p3, %p4038_p0 }
0x12a3   :  { %v2912_v3 = vpop.xlane.xlu1 %2911 }
0x12a4   :  { %v2918_v1 = vmul.f32 0.0078125, %v2912_v3 }
0x12a6   :  { %v2922_v2 = vadd.f32 1e-12, %v2918_v1 }
0x12a7   :  { %v2910_v41 = vpop.xlane.xlu1 %2909  ;;  %v2914_v5 = vpop.xlane.xlu0 %2913 }
0x12a8   :  { %4021 = vrsqrt.f32 %v2922_v2  ;;  %v2917_v6 = vmul.f32 0.0078125, %v2910_v41  ;;  %v2919_v36 = vmul.f32 0.0078125, %v2914_v5 }
0x12aa   :  { %v2921_v46 = vadd.f32 1e-12, %v2917_v6  ;;  %v2923_v32 = vadd.f32 1e-12, %v2919_v36 }
0x12ab   :  { %v1261_v7 = vpop.xlane.xlu1 %1260  ;;  %v2916_v10 = vpop.xlane.xlu0 %2915 }
0x12ac   :  { %4023 = vrsqrt.f32 %v2921_v46  ;;  %v1263_v15 = vmul.f32 0.0078125, %v1261_v7  ;;  %v2920_v18 = vmul.f32 0.0078125, %v2916_v10 }
0x12ad   :  { %4025 = vrsqrt.f32 %v2923_v32 }
0x12ae   :  { %v1265_v20 = vadd.f32 1e-12, %v1263_v15  ;;  %v2924_v21 = vadd.f32 1e-12, %v2920_v18 }
0x12af   :  { %v1259_v22 = vpop.xlane.xlu0 %1258 }
0x12b0   :  { %4027 = vrsqrt.f32 %v1265_v20  ;;  %v1262_v12 = vmul.f32 0.0078125, %v1259_v22 }
0x12b1   :  { %4029 = vrsqrt.f32 %v2924_v21 }
0x12b2   :  { %v1264_v24 = vadd.f32 1e-12, %v1262_v12 }
0x12b4   :  { %4031 = vrsqrt.f32 %v1264_v24 }
0x12b5   :  { %v4022_v0 = vpop.eup %4021 }
0x12b6   :  { %v2930_v25 = vmul.f32 %v4022_v0, %v2902_v49 }
0x12b8   :  { %v2940_v4 = vmul.f32 %v3415_v16, %v2930_v25 }
0x12b9   :  { %v4024_v53 = vpop.eup %4023 }
0x12ba   :  { %v4026_v26 = vpop.eup %4025  ;;  %v2929_v27 = vmul.f32 %v4024_v53, %v2901_v56  ;;  %v2950_v39 = vadd.f32 %v3416_v31, %v2940_v4 }
0x12bb   :  { %v2931_v34 = vmul.f32 %v4026_v26, %v2903_v55 }
0x12bc   :  { %v2939_v35 = vmul.f32 %v3415_v16, %v2929_v27  ;;  %v2963_v33 = vrot.slane %v2950_v39, 7 }
0x12bd   :  { %v4028_v30 = vpop.eup %4027  ;;  %v2941_v28 = vmul.f32 %v3415_v16, %v2931_v34 }
0x12be   :  { %v4030_v42 = vpop.eup %4029  ;;  %v1269_v13 = vmul.f32 %v4028_v30, %v1255_v44  ;;  %v2949_v40 = vadd.f32 %v3416_v31, %v2939_v35 }
0x12bf   :  { %v2932_v29 = vmul.f32 %v4030_v42, %v2904_v59  ;;  %v2951_v61 = vadd.f32 %v3416_v31, %v2941_v28  ;;  %v3046_v59 = vmul.u32 2, %v4335_v11 }
0x12c0   :  { %v1277_v47 = vmul.f32 %v3192_v19, %v1269_v13  ;;  %v2964_v55 = vsel %vm2956_vm12, %v2963_v33, %v2949_v40 }
0x12c1   :  { %v4032_v48 = vpop.eup %4031  ;;  %v2942_v49 = vmul.f32 %v3415_v16, %v2932_v29  ;;  %v2965_v50 = vrot.slane %v2951_v61, 6  ;;  %vm3047_vm0 = vcmp.eq.s32.totalorder %v4217_v14, %v3046_v59 }
0x12c2   :  { %v1268_v38 = vmul.f32 %v4032_v48, %v1254_v9  ;;  %v1285_v51 = vadd.f32 %v3193_v43, %v1277_v47 }
0x12c3   :  { %v2952_v54 = vadd.f32 %v3416_v31, %v2942_v49  ;;  %v2967_v63 = vsel %vm2966_vm13, %v2965_v50, %v2964_v55 }
0x12c4   :  { %v1276_v56 = vmul.f32 %v3192_v19, %v1268_v38  ;;  %v2955_v45 = vrot.slane %v1285_v51, 7 }
0x12c5   :  { %v2968_v60 = vrot.slane %v2952_v54, 5 }
0x12c6   :  { %v1284_v57 = vadd.f32 %v3193_v43, %v1276_v56 }
0x12c7   :  { %v2970_v58 = vsel %vm2969_vm14, %v2968_v60, %v2967_v63 }
0x12c8   :  { %3761 = vmatpush3.xpose.msra.mxu0 %v2970_v58  ;;  %v2957_v8 = vsel %vm2956_vm12, %v2955_v45, %v1284_v57 }
0x12cb   :  { %3763 = vmatmul.mubr.f32.vlgmr.msra.gmra.mxu0 %v2957_v8 }
0x138b   :  { %v3038_v44 = vpop.f32.mrf.mxu0 }
0x138c   :  { %v3048_v62 = vsel %vm3042_vm15, %v3038_v44, -inf  ;;  %3043 = vst.msk [vmem:[#allocation2] sm:$0x3] %vm3042_vm15, %v3038_v44  ;;  %v3060_v37 = vsel %vm3047_vm0, %v3038_v44, 0.0 }
0x138d   :  { %3049 = vmax.xlane.f32.xlu1 %v3048_v62  ;;  %v3764_v23 = vpop.f32.mrf.mxu0  ;;  %v3061_v52 = vsel %vm3042_vm15, %v3060_v37, 0.0 }
0x1391   :  { %3062 = vadd.xlane.f32.xlu1 %v3061_v52 }
0x1416   :  { %v3050_v9 = vpop.xlane.xlu1 %3049 }
0x1417   :  { %v3051_v17 = vsub.f32 %v3038_v44, %v3050_v9 }
0x1419   :  { %v3052_v3 = vmul.f32 1.442695, %v3051_v17 }
0x141b   :  { %4033 = vpow2.f32 %v3052_v3 }
0x1428   :  { %v4034_v1 = vpop.eup %4033 }
0x1429   :  { %v3054_v2 = vsel %vm3042_vm15, %v4034_v1, 0.0 }
0x142a   :  { %3055 = vadd.xlane.f32.xlu0 %v3054_v2 }
0x142b   :  { %4048 = shalt.err (!%p4045_p4)
}
0x142c   :  { %3085 = dma.vmem_to_hbm [thread:$0]  %s3083_s24, 32, %s5028_s15, [#allocation3]   ;;  %v3063_v6 = vpop.xlane.xlu1 %3062  ;;  %vm3065_vm1 = vcmask 1041408   ;;  %vm3074_vm2 = vcmask 0  }
0x142d   :  { %s4086_s26 = smov [#allocation4]  }
0x142e   :  { %s3092_s4 = sshll.u32 %s4086_s26, 4  ;;  %s3093_s4 = int_to_ptr.vmem [resolvable:$true] %s3092_s4 }
0x142f   :  { %s4057_s15 = scalar_lea.vmem %s3093_s4, 16  ;;  %s4061_s1 = scalar_lea.vmem %s3093_s4, 32 }
0x1430   :  { %p4058_p5 = scmp.ne.s32.totalorder %s3093_s4, %s4057_s15  ;;  %p4062_p6 = scmp.lt.s32.totalorder %s3093_s4, %s3093_s4 }
0x1431   :  { %p4063_p7 = scmp.lt.s32.totalorder %s4061_s1, %s4057_s15 }
0x1433   :  { %p4064_p8 = por %p4063_p7, %p4062_p6 }
0x1435   :  { %p4065_p9 = pnand %p4064_p8, %p4058_p5 }
0x14b3   :  { %v3056_v14 = vpop.xlane.xlu0 %3055 }
0x14b4   :  { %4035 = vlog2.f32 %v3056_v14 }
0x14c1   :  { %v4036_v11 = vpop.eup %4035 }
0x14c2   :  { %v3058_v41 = vmul.f32 0.6931472, %v4036_v11 }
0x14c4   :  { %v3059_v5 = vadd.f32 %v3058_v41, %v3050_v9 }
0x14c6   :  { %v3064_v36 = vsub.f32 %v3059_v5, %v3063_v6 }
0x14c8   :  { %v3066_v46 = vsel %vm3065_vm1, %v3064_v36, 0.0 }
0x14c9   :  { %v3067_v32 = vrot.slane %v3066_v46, 4 }
0x14cb   :  { %v3068_v7 = vadd.f32 %v3067_v32, %v3066_v46 }
0x14cd   :  { %v3069_v10 = vrot.slane %v3068_v7, 2 }
0x14cf   :  { %v3070_v15 = vadd.f32 %v3069_v10, %v3068_v7 }
0x14d1   :  { %v3071_v18 = vrot.slane %v3070_v15, 1 }
0x14d3   :  { %v3072_v20 = vadd.f32 %v3071_v18, %v3070_v15 }
0x14d5   :  { %v3073_v21 = vmul.f32 0.5, %v3072_v20 }
0x14d7   :  { %3075 = vst.msk [vmem:[#allocation4] sm:$0x1] %vm3074_vm2, %v3073_v21 }
0x14d8   :  { %4068 = shalt.err (!%p4065_p9)
}
0x14d9   :  { %3095 = dma.vmem_to_hbm [thread:$0]  %s3093_s4, 16, %s5029_s16, [#allocation5]  }
0x14da   :  { %4077 = dma.done.wait [#allocation3], 32  }
0x14db   :  { %4078 = vsyncadd [#allocation3], 4294967264 }
0x14dc   :  { %4079 = dma.done.wait [#allocation5], 16  }
0x14dd   :  { %4080 = vsyncadd [#allocation5], 4294967280 }
0x14de   :  { %3102 = vsyncpa [#allocation3], 1 }
0x14df   :  { %3103 = vsyncpa [#allocation5], 1 }

</bundles_post_ra>
